<compile_context>
chip_gen: v6e
topology: v6e:2x2x1
jax: 0.10.0
libtpu: 0.0.40
codegen_flags: <defaults>
</compile_context>

<pallas_src>
import functools

import jax
import jax.numpy as jnp
from jax.experimental import pallas as pl
from jax.experimental.pallas import tpu as pltpu


_SCATTER_CHUNK = 256   # source positions per one-hot scatter chunk (bounds VMEM temporaries)
_NEG_BIG = -1e30       # bias for padded vocab columns: exp() underflows to exactly 0


def _round_up(x, m):
    return (x + m - 1) // m * m


def _tpu_vmem_capacity_bytes():
    cap = 64 * 1024 * 1024   # conservative default (v7x per-core VMEM)
    try:
        info = pltpu.get_tpu_info()
        cap = int(getattr(info, "vmem_capacity_bytes", cap)) or cap
    except Exception:
        pass
    return cap


def _est_vmem_bytes(BB, TV, T, S, H, nh, w_bytes, a_bytes):
    """Rough double-buffered VMEM footprint of the two kernels for a (BB, TV) tiling."""
    R = BB * T
    f32 = 4
    k1 = (2 * 2 * R * H * a_bytes            # x / emb blocks
          + 2 * BB * nh * T * S * f32        # dec_attn block
          + 2 * BB * S * H * f32             # src_enc block
          + 2 * 3 * H * TV * w_bytes         # W_proj vocab tile
          + 2 * TV * f32                     # b_proj vocab tile
          + 2 * 3 * H * w_bytes              # W_copy
          + 2 * R * TV * f32                 # logits out tile
          + 2 * BB * T * S * f32             # attn_dist out
          + 2 * 4 * R * f32                  # p_gen / lse outs
          + R * H * a_bytes + 2 * R * f32)   # scratch: atts, running max, running sum
    sc = min(S, _SCATTER_CHUNK)
    k2 = (2 * 2 * R * TV * f32               # logits in + pred out tiles
          + 2 * BB * T * S * f32             # attn_dist block
          + 2 * BB * S * 4                   # tokens block
          + 2 * 4 * R * f32                  # lse / p_gen
          + 2 * BB * sc * TV * f32)          # one-hot scatter staging
    return max(k1, k2)


def _prep_logits_kernel(x_ref, emb_ref, attn_w_ref, src_ref, wp_ref, bp_ref, wc_ref, bc_ref,
                        logits_ref, attn_out_ref, pgen_ref, lse_ref,
                        atts_sc, m_sc, l_sc):
    v = pl.program_id(1)
    nv = pl.num_programs(1)
    R, H = x_ref.shape

    # ---- once per batch block: copy-attention dist, attended context, p_gen -------------
    @pl.when(v == 0)
    def _init():
        attn_dist = jnp.sum(attn_w_ref[...].astype(jnp.float32), axis=1)          # (BB,T,S)
        attn_out_ref[...] = attn_dist.astype(attn_out_ref.dtype)
        atts = jnp.einsum('bts,bsh->bth', attn_dist, src_ref[...].astype(jnp.float32),
                          preferred_element_type=jnp.float32)                      # (BB,T,H)
        atts_flat = atts.reshape(R, H).astype(atts_sc.dtype)
        atts_sc[...] = atts_flat
        # p_gen = sigmoid([x, emb, atts] @ W_copy + b_copy) via split-K dots (no concat).
        gate = (jnp.dot(x_ref[...], wc_ref[0:H, :], preferred_element_type=jnp.float32)
                + jnp.dot(emb_ref[...], wc_ref[H:2 * H, :], preferred_element_type=jnp.float32)
                + jnp.dot(atts_flat, wc_ref[2 * H:, :], preferred_element_type=jnp.float32)
                + bc_ref[0, 0])
        pgen_ref[...] = jax.nn.sigmoid(gate)
        m_sc[...] = jnp.full(m_sc.shape, -jnp.inf, m_sc.dtype)
        l_sc[...] = jnp.zeros(l_sc.shape, l_sc.dtype)

    # ---- per vocab tile: split-K projection (single matmul pass), store raw logits ------
    logits = (jnp.dot(x_ref[...], wp_ref[0:H, :], preferred_element_type=jnp.float32)
              + jnp.dot(emb_ref[...], wp_ref[H:2 * H, :], preferred_element_type=jnp.float32)
              + jnp.dot(atts_sc[...], wp_ref[2 * H:, :], preferred_element_type=jnp.float32)
              + bp_ref[...])                                                        # (R, TV) f32
    logits_ref[...] = logits

    # ---- online logsumexp accumulation over vocab tiles ----------------------------------
    row_max = jnp.max(logits, axis=-1, keepdims=True)
    m_new = jnp.maximum(m_sc[...], row_max)
    l_sc[...] = (l_sc[...] * jnp.exp(m_sc[...] - m_new)
                 + jnp.sum(jnp.exp(logits - m_new), axis=-1, keepdims=True))
    m_sc[...] = m_new

    @pl.when(v == nv - 1)
    def _final():
        lse_ref[...] = m_sc[...] + jnp.log(l_sc[...])


def _finalize_kernel(logits_ref, lse_ref, pgen_ref, attn_ref, tok_ref, pred_ref):
    BB, T, S = attn_ref.shape
    R, TV = logits_ref.shape
    base = pl.program_id(1) * TV

    # p_gen * log_softmax, using the precomputed per-row LSE (no matmul recompute here).
    pred = pgen_ref[...] * (logits_ref[...] - lse_ref[...])                         # (R, TV)

    # scatter_add of attn_dist into this vocab tile, chunked over source positions.
    lane = jax.lax.broadcasted_iota(jnp.int32, (1, 1, TV), 2)
    acc = jnp.zeros((BB, T, TV), jnp.float32)
    for s0 in range(0, S, _SCATTER_CHUNK):
        s1 = min(S, s0 + _SCATTER_CHUNK)
        one_hot = ((tok_ref[:, s0:s1, :] - base) == lane).astype(jnp.float32)       # (BB,c,TV)
        acc = acc + jnp.einsum('bts,bsv->btv', attn_ref[:, :, s0:s1], one_hot,
                               preferred_element_type=jnp.float32)
    pred_ref[...] = pred + acc.reshape(R, TV)


@functools.partial(jax.jit, static_argnames=("block_batch", "tile_v", "compute_dtype"))
def word_prob_layer(x, emb, dec_attn, src_enc, tokens,
                    w_proj, b_proj, w_copy, b_copy,
                    *, block_batch=None, tile_v=None, compute_dtype=None):
    B, T, H = x.shape
    _, nh, _, S = dec_attn.shape
    H3, V = w_proj.shape
    assert H3 == 3 * H

    cdt = jnp.dtype(compute_dtype) if compute_dtype is not None else jnp.dtype(x.dtype)
    cbytes = cdt.itemsize

    cap = _tpu_vmem_capacity_bytes()
    select_budget = int(cap * 0.55)          # leave headroom for Mosaic internal scratch
    vmem_limit = int(cap * 0.85)             # ~110 MiB on v5e/v6e, ~54 MiB on v7x

    # ---- tile selection (VMEM-budget aware) ------------------------------------------
    tv_cap = _round_up(max(V, 128), 128)
    if tile_v is not None:
        assert tile_v % 128 == 0, "tile_v must be a multiple of 128 lanes"
        tv_cands = [min(tile_v, tv_cap)]
    else:
        tv_cands = [tv for tv in (2048, 1024, 512, 256, 128) if tv <= tv_cap] or [tv_cap]

    if block_batch is not None:
        bb0 = max(1, min(block_batch, B))
        while B % bb0:
            bb0 -= 1
        bb_cands = [bb0]
    else:
        # target ~512 MXU rows per step; prefer an even number of batch blocks (v7x megacore)
        bb_cands = sorted((d for d in range(1, B + 1) if B % d == 0),
                          key=lambda d: (abs(d * T - 512), (B // d) % 2, d))

    BB = TV = None
    for bb in bb_cands:
        if (bb * T) % 8 and bb != B:
            continue                          # flattened (R, .) blocks need sublane-aligned rows
        for tv in tv_cands:
            if _est_vmem_bytes(bb, tv, T, S, H, nh, cbytes, cbytes) <= select_budget:
                BB, TV = bb, tv
                break
        if BB is not None:
            break
    if BB is None:                            # nothing met the budget: smallest footprint combo
        BB, TV = bb_cands[-1], tv_cands[-1]
    if (BB * T) % 8 and BB != B:
        BB = B                                # guarantee a legal flat block shape
    R = BB * T
    Vp = _round_up(V, TV)
    nV = Vp // TV
    nb = B // BB

    # ---- operand prep: flatten activations, pad vocab, cast MXU operands ---------------
    xf = x.reshape(B * T, H).astype(cdt)
    ef = emb.reshape(B * T, H).astype(cdt)
    bp = jnp.asarray(b_proj, jnp.float32).reshape(1, V)
    wp = jnp.asarray(w_proj)
    if Vp != V:
        wp = jnp.pad(wp, ((0, 0), (0, Vp - V)))
        bp = jnp.pad(bp, ((0, 0), (0, Vp - V)), constant_values=_NEG_BIG)
    wp = wp.astype(cdt)
    wc = jnp.asarray(w_copy).astype(cdt)
    bc = jnp.asarray(b_copy, jnp.float32).reshape(1, 1)
    tok = jnp.asarray(tokens, jnp.int32).reshape(B, S, 1)
    dec_attn = jnp.asarray(dec_attn, jnp.float32)
    src_enc = jnp.asarray(src_enc, jnp.float32)

    # ---- kernel 1: attn_dist / atts / p_gen + single-pass logits + online LSE ----------
    prep_spec = pltpu.PrefetchScalarGridSpec(
        num_scalar_prefetch=0,
        grid=(nb, nV),
        in_specs=[
            pl.BlockSpec((R, H), lambda b, v: (b, 0)),                 # x  (flattened rows)
            pl.BlockSpec((R, H), lambda b, v: (b, 0)),                 # emb
            pl.BlockSpec((BB, nh, T, S), lambda b, v: (b, 0, 0, 0)),   # dec_attn
            pl.BlockSpec((BB, S, H), lambda b, v: (b, 0, 0)),          # src_enc
            pl.BlockSpec((H3, TV), lambda b, v: (0, v)),               # W_proj (streamed over V)
            pl.BlockSpec((1, TV), lambda b, v: (0, v)),                # b_proj
            pl.BlockSpec((H3, 1), lambda b, v: (0, 0)),                # W_copy (resident)
            pl.BlockSpec(memory_space=pltpu.MemorySpace.SMEM),         # b_copy (scalar path)
        ],
        out_specs=[
            pl.BlockSpec((R, TV), lambda b, v: (b, v)),                # raw logits (streamed)
            pl.BlockSpec((BB, T, S), lambda b, v: (b, 0, 0)),          # attn_dist
            pl.BlockSpec((R, 1), lambda b, v: (b, 0)),                 # p_gen
            pl.BlockSpec((R, 1), lambda b, v: (b, 0)),                 # lse
        ],
        scratch_shapes=[
            pltpu.VMEM((R, H), cdt),           # attended context (flattened rows)
            pltpu.VMEM((R, 1), jnp.float32),   # running max
            pltpu.VMEM((R, 1), jnp.float32),   # running sum(exp)
        ],
    )
    logits, attn_dist, pgen, lse = pl.pallas_call(
        _prep_logits_kernel,
        out_shape=(jax.ShapeDtypeStruct((B * T, Vp), jnp.float32),
                   jax.ShapeDtypeStruct((B, T, S), jnp.float32),
                   jax.ShapeDtypeStruct((B * T, 1), jnp.float32),
                   jax.ShapeDtypeStruct((B * T, 1), jnp.float32)),
        grid_spec=prep_spec,
        compiler_params=pltpu.CompilerParams(
            dimension_semantics=("parallel", "arbitrary"),
            vmem_limit_bytes=vmem_limit),
    )(xf, ef, dec_attn, src_enc, wp, bp, wc, bc)

    # ---- kernel 2: normalize, gate with p_gen, fuse scatter; overwrite logits in place ---
    fin_spec = pltpu.PrefetchScalarGridSpec(
        num_scalar_prefetch=0,
        grid=(nb, nV),
        in_specs=[
            pl.BlockSpec((R, TV), lambda b, v: (b, v)),                # logits (aliased -> pred)
            pl.BlockSpec((R, 1), lambda b, v: (b, 0)),                 # lse
            pl.BlockSpec((R, 1), lambda b, v: (b, 0)),                 # p_gen
            pl.BlockSpec((BB, T, S), lambda b, v: (b, 0, 0)),          # attn_dist
            pl.BlockSpec((BB, S, 1), lambda b, v: (b, 0, 0)),          # tokens
        ],
        out_specs=pl.BlockSpec((R, TV), lambda b, v: (b, v)),          # pred
    )
    pred_flat = pl.pallas_call(
        _finalize_kernel,
        out_shape=jax.ShapeDtypeStruct((B * T, Vp), jnp.float32),
        grid_spec=fin_spec,
        input_output_aliases={0: 0},      # pred reuses the logits HBM buffer
        compiler_params=pltpu.CompilerParams(
            dimension_semantics=("parallel", "parallel"),
            vmem_limit_bytes=vmem_limit),
    )(logits, lse, pgen, attn_dist, tok)

    pred = pred_flat[:, :V].reshape(B, T, V)
    return pred, attn_dist


def reference(x, emb, dec_attn, src_enc, tokens, w_proj, b_proj, w_copy, b_copy):
    attn_dist = jnp.sum(dec_attn, axis=1)
    atts = jnp.einsum('bts,bsh->bth', attn_dist, src_enc)
    feats = jnp.concatenate([x, emb, atts], axis=-1)
    pred = jax.nn.log_softmax(feats @ w_proj + b_proj[0], axis=-1)
    p_gen = jax.nn.sigmoid(feats @ w_copy + b_copy[0])
    one_hot = jax.nn.one_hot(tokens[..., 0], w_proj.shape[1], dtype=jnp.float32)
    scat = jnp.einsum('bts,bsv->btv', attn_dist, one_hot)
    return p_gen * pred + scat, attn_dist


if __name__ == "__main__":
    # V=500 (not a multiple of 128) deliberately exercises the vocab-padding path.
    B, nheads, T, S, H, V = 2, 4, 8, 16, 32, 500
    H3 = 3 * H

    key = jax.random.PRNGKey(0)
    ks = jax.random.split(key, 8)

    x = jax.random.normal(ks[0], (B, T, H), dtype=jnp.float32)
    emb = jax.random.normal(ks[1], (B, T, H), dtype=jnp.float32)
    dec_attn_raw = jax.random.uniform(ks[2], (B, nheads, T, S), dtype=jnp.float32)
    dec_attn = dec_attn_raw / jnp.sum(dec_attn_raw, axis=-1, keepdims=True)
    src_enc = jax.random.normal(ks[3], (B, S, H), dtype=jnp.float32)
    tokens = jax.random.randint(ks[4], (B, S, 1), 0, V, dtype=jnp.int32)

    w_proj = jax.random.normal(ks[5], (H3, V), dtype=jnp.float32) * (1.0 / jnp.sqrt(H3))
    b_proj = jnp.zeros((1, V), dtype=jnp.float32)
    w_copy = jax.random.normal(ks[6], (H3, 1), dtype=jnp.float32) * (1.0 / jnp.sqrt(H3))
    b_copy = jnp.zeros((1, 1), dtype=jnp.float32)

    pred_ref, attn_ref = reference(x, emb, dec_attn, src_enc, tokens,
                                   w_proj, b_proj, w_copy, b_copy)

    # f32 path, explicit tile_v=256 -> 2 vocab tiles + 12 padded columns: exercises the
    # store-logits / reload structure, the online LSE across tiles, and the per-tile scatter.
    pred, attn_dist = word_prob_layer(x, emb, dec_attn, src_enc, tokens,
                                      w_proj, b_proj, w_copy, b_copy, tile_v=256)
    jax.block_until_ready((pred, attn_dist))
    assert jnp.allclose(attn_dist, attn_ref, atol=1e-5, rtol=1e-5)
    assert jnp.allclose(pred, pred_ref, atol=1e-4, rtol=1e-4)

    # bf16 MXU operands with automatic (VMEM-budget aware) tile selection; f32 accumulation.
    pred_bf, attn_bf = word_prob_layer(x, emb, dec_attn, src_enc, tokens,
                                       w_proj, b_proj, w_copy, b_copy,
                                       compute_dtype=jnp.bfloat16)
    jax.block_until_ready((pred_bf, attn_bf))
    assert jnp.allclose(attn_bf, attn_ref, atol=1e-5, rtol=1e-5)
    assert jnp.allclose(pred_bf, pred_ref, atol=2e-1, rtol=5e-2)

    print("KERNEL_OK")
</pallas_src>

<mosaic_0001>
module attributes {stable_mosaic.version = 11 : i64} {
  func.func @_prep_logits_kernel(%arg0: i32, %arg1: i32, %arg2: memref<16x32xf32, #tpu.memory_space<vmem>>, %arg3: memref<16x32xf32, #tpu.memory_space<vmem>>, %arg4: memref<2x4x8x16xf32, #tpu.memory_space<vmem>>, %arg5: memref<2x16x32xf32, #tpu.memory_space<vmem>>, %arg6: memref<96x256xf32, #tpu.memory_space<vmem>>, %arg7: memref<1x256xf32, #tpu.memory_space<vmem>>, %arg8: memref<96x1xf32, #tpu.memory_space<vmem>>, %arg9: memref<1x1xf32, #tpu.memory_space<smem>>, %arg10: memref<16x256xf32, #tpu.memory_space<vmem>>, %arg11: memref<2x8x16xf32, #tpu.memory_space<vmem>>, %arg12: memref<16x1xf32, #tpu.memory_space<vmem>>, %arg13: memref<16x1xf32, #tpu.memory_space<vmem>>, %arg14: memref<16x32xf32, #tpu.memory_space<vmem>>, %arg15: memref<16x1xf32, #tpu.memory_space<vmem>>, %arg16: memref<16x1xf32, #tpu.memory_space<vmem>>) attributes {dimension_semantics = [#tpu.dimension_semantics<parallel>, #tpu.dimension_semantics<arbitrary>], iteration_bounds = array<i64: 1, 2>, scalar_prefetch = 0 : i64, scratch_operands = 3 : i64, tpu.core_type = #tpu.core_type<tc>, window_params = [{transform_indices = @transform_0, window_bounds = array<i64: 16, 32>}, {transform_indices = @transform_1, window_bounds = array<i64: 16, 32>}, {transform_indices = @transform_2, window_bounds = array<i64: 2, 4, 8, 16>}, {transform_indices = @transform_3, window_bounds = array<i64: 2, 16, 32>}, {transform_indices = @transform_4, window_bounds = array<i64: 96, 256>}, {transform_indices = @transform_5, window_bounds = array<i64: 1, 256>}, {pipeline_mode = #tpu.pipeline_mode<synchronous>, transform_indices = @transform_6, window_bounds = array<i64: 96, 1>}, {transform_indices = @transform_7, window_bounds = array<i64: 1, 1>}, {transform_indices = @transform_8, window_bounds = array<i64: 16, 256>}, {transform_indices = @transform_9, window_bounds = array<i64: 2, 8, 16>}, {transform_indices = @transform_10, window_bounds = array<i64: 16, 1>}, {transform_indices = @transform_11, window_bounds = array<i64: 16, 1>}]} {
    %c0_i32 = arith.constant 0 : i32
    %0 = arith.cmpi eq, %arg1, %c0_i32 : i32
    %1 = arith.extui %0 : i1 to i32
    %c0_i32_0 = arith.constant 0 : i32
    %2 = arith.cmpi ne, %1, %c0_i32_0 : i32
    scf.if %2 {
      %c0_29 = arith.constant 0 : index
      %c0_30 = arith.constant 0 : index
      %c0_31 = arith.constant 0 : index
      %c0_32 = arith.constant 0 : index
      %38 = vector.load %arg4[%c0_29, %c0_30, %c0_31, %c0_32] : memref<2x4x8x16xf32, #tpu.memory_space<vmem>>, vector<2x4x8x16xf32>
      %cst_33 = arith.constant dense<0.000000e+00> : vector<2x8x16xf32>
      %39 = vector.multi_reduction <add>, %38, %cst_33 [1] : vector<2x4x8x16xf32> to vector<2x8x16xf32>
      %c0_34 = arith.constant 0 : index
      %c0_35 = arith.constant 0 : index
      %c0_36 = arith.constant 0 : index
      %40 = vector.load %arg11[%c0_34, %c0_35, %c0_36] : memref<2x8x16xf32, #tpu.memory_space<vmem>>, vector<2x8x16xf32>
      tpu.vector_store %arg11[%c0_34, %c0_35, %c0_36], %39 {strides = array<i32>} : memref<2x8x16xf32, #tpu.memory_space<vmem>>, vector<2x8x16xf32>,
      %c0_37 = arith.constant 0 : index
      %c0_38 = arith.constant 0 : index
      %c0_39 = arith.constant 0 : index
      %41 = vector.load %arg5[%c0_37, %c0_38, %c0_39] : memref<2x16x32xf32, #tpu.memory_space<vmem>>, vector<2x16x32xf32>
      "tpu.trace_start"() <{level = 10 : i32, message = "bts,bsh->bth"}> : () -> ()
      %cst_40 = arith.constant dense<0.000000e+00> : vector<2x8x32xf32>
      %42 = tpu.matmul %39, %41, %cst_40 {dimension_numbers = #tpu.dot_dimension_numbers<[2], [1], [1], [2], [0, 0, 0, 1, 1, 2], [0], [0]>} : vector<2x8x16xf32>, vector<2x16x32xf32>, vector<2x8x32xf32> -> vector<2x8x32xf32>
      "tpu.trace_stop"() : () -> ()
      %43 = vector.shape_cast %42 : vector<2x8x32xf32> to vector<16x32xf32>
      %c0_41 = arith.constant 0 : index
      %c0_42 = arith.constant 0 : index
      %44 = vector.load %arg14[%c0_41, %c0_42] : memref<16x32xf32, #tpu.memory_space<vmem>>, vector<16x32xf32>
      tpu.vector_store %arg14[%c0_41, %c0_42], %43 {strides = array<i32>} : memref<16x32xf32, #tpu.memory_space<vmem>>, vector<16x32xf32>,
      %c0_43 = arith.constant 0 : index
      %c0_44 = arith.constant 0 : index
      %45 = vector.load %arg2[%c0_43, %c0_44] : memref<16x32xf32, #tpu.memory_space<vmem>>, vector<16x32xf32>
      %c0_45 = arith.constant 0 : index
      %c0_46 = arith.constant 0 : index
      %46 = vector.load %arg8[%c0_45, %c0_46] : memref<96x1xf32, #tpu.memory_space<vmem>>, vector<32x1xf32>
      %cst_47 = arith.constant dense<0.000000e+00> : vector<16x1xf32>
      %47 = tpu.matmul %45, %46, %cst_47 {dimension_numbers = #tpu.dot_dimension_numbers<[1], [0], [0], [1], [0, 0, 1, 1], [], []>} : vector<16x32xf32>, vector<32x1xf32>, vector<16x1xf32> -> vector<16x1xf32>
      %c0_48 = arith.constant 0 : index
      %c0_49 = arith.constant 0 : index
      %48 = vector.load %arg3[%c0_48, %c0_49] : memref<16x32xf32, #tpu.memory_space<vmem>>, vector<16x32xf32>
      %c32_50 = arith.constant 32 : index
      %c0_51 = arith.constant 0 : index
      %49 = vector.load %arg8[%c32_50, %c0_51] : memref<96x1xf32, #tpu.memory_space<vmem>>, vector<32x1xf32>
      %cst_52 = arith.constant dense<0.000000e+00> : vector<16x1xf32>
      %50 = tpu.matmul %48, %49, %cst_52 {dimension_numbers = #tpu.dot_dimension_numbers<[1], [0], [0], [1], [0, 0, 1, 1], [], []>} : vector<16x32xf32>, vector<32x1xf32>, vector<16x1xf32> -> vector<16x1xf32>
      %51 = arith.addf %47, %50 : vector<16x1xf32>
      %c64_53 = arith.constant 64 : index
      %c0_54 = arith.constant 0 : index
      %52 = vector.load %arg8[%c64_53, %c0_54] : memref<96x1xf32, #tpu.memory_space<vmem>>, vector<32x1xf32>
      %cst_55 = arith.constant dense<0.000000e+00> : vector<16x1xf32>
      %53 = tpu.matmul %43, %52, %cst_55 {dimension_numbers = #tpu.dot_dimension_numbers<[1], [0], [0], [1], [0, 0, 1, 1], [], []>} : vector<16x32xf32>, vector<32x1xf32>, vector<16x1xf32> -> vector<16x1xf32>
      %54 = arith.addf %51, %53 : vector<16x1xf32>
      %c0_56 = arith.constant 0 : index
      %c0_57 = arith.constant 0 : index
      %55 = memref.load %arg9[%c0_56, %c0_57] : memref<1x1xf32, #tpu.memory_space<smem>>
      %56 = vector.broadcast %55 : f32 to vector<16x1xf32>
      %57 = arith.addf %54, %56 : vector<16x1xf32>
      %58 = arith.negf %57 : vector<16x1xf32>
      %59 = math.exp %58 : vector<16x1xf32>
      %cst_58 = arith.constant 1.000000e+00 : f32
      %60 = vector.broadcast %cst_58 : f32 to vector<16x1xf32>
      %61 = arith.addf %60, %59 : vector<16x1xf32>
      %62 = arith.divf %60, %61 : vector<16x1xf32>
      %c0_59 = arith.constant 0 : index
      %c0_60 = arith.constant 0 : index
      %63 = vector.load %arg12[%c0_59, %c0_60] : memref<16x1xf32, #tpu.memory_space<vmem>>, vector<16x1xf32>
      tpu.vector_store %arg12[%c0_59, %c0_60], %62 {strides = array<i32>} : memref<16x1xf32, #tpu.memory_space<vmem>>, vector<16x1xf32>,
      %cst_61 = arith.constant 0xFF800000 : f32
      %64 = vector.broadcast %cst_61 : f32 to vector<16x1xf32>
      %c0_62 = arith.constant 0 : index
      %c0_63 = arith.constant 0 : index
      %65 = vector.load %arg15[%c0_62, %c0_63] : memref<16x1xf32, #tpu.memory_space<vmem>>, vector<16x1xf32>
      tpu.vector_store %arg15[%c0_62, %c0_63], %64 {strides = array<i32>} : memref<16x1xf32, #tpu.memory_space<vmem>>, vector<16x1xf32>,
      %cst_64 = arith.constant 0.000000e+00 : f32
      %66 = vector.broadcast %cst_64 : f32 to vector<16x1xf32>
      %c0_65 = arith.constant 0 : index
      %c0_66 = arith.constant 0 : index
      %67 = vector.load %arg16[%c0_65, %c0_66] : memref<16x1xf32, #tpu.memory_space<vmem>>, vector<16x1xf32>
      tpu.vector_store %arg16[%c0_65, %c0_66], %66 {strides = array<i32>} : memref<16x1xf32, #tpu.memory_space<vmem>>, vector<16x1xf32>,
    } else {
    }
    %c0 = arith.constant 0 : index
    %c0_1 = arith.constant 0 : index
    %3 = vector.load %arg2[%c0, %c0_1] : memref<16x32xf32, #tpu.memory_space<vmem>>, vector<16x32xf32>
    %c0_2 = arith.constant 0 : index
    %c0_3 = arith.constant 0 : index
    %4 = vector.load %arg6[%c0_2, %c0_3] : memref<96x256xf32, #tpu.memory_space<vmem>>, vector<32x256xf32>
    %cst = arith.constant dense<0.000000e+00> : vector<16x256xf32>
    %5 = tpu.matmul %3, %4, %cst {dimension_numbers = #tpu.dot_dimension_numbers<[1], [0], [0], [1], [0, 0, 1, 1], [], []>} : vector<16x32xf32>, vector<32x256xf32>, vector<16x256xf32> -> vector<16x256xf32>
    %c0_4 = arith.constant 0 : index
    %c0_5 = arith.constant 0 : index
    %6 = vector.load %arg3[%c0_4, %c0_5] : memref<16x32xf32, #tpu.memory_space<vmem>>, vector<16x32xf32>
    %c32 = arith.constant 32 : index
    %c0_6 = arith.constant 0 : index
    %7 = vector.load %arg6[%c32, %c0_6] : memref<96x256xf32, #tpu.memory_space<vmem>>, vector<32x256xf32>
    %cst_7 = arith.constant dense<0.000000e+00> : vector<16x256xf32>
    %8 = tpu.matmul %6, %7, %cst_7 {dimension_numbers = #tpu.dot_dimension_numbers<[1], [0], [0], [1], [0, 0, 1, 1], [], []>} : vector<16x32xf32>, vector<32x256xf32>, vector<16x256xf32> -> vector<16x256xf32>
    %9 = arith.addf %5, %8 : vector<16x256xf32>
    %c0_8 = arith.constant 0 : index
    %c0_9 = arith.constant 0 : index
    %10 = vector.load %arg14[%c0_8, %c0_9] : memref<16x32xf32, #tpu.memory_space<vmem>>, vector<16x32xf32>
    %c64 = arith.constant 64 : index
    %c0_10 = arith.constant 0 : index
    %11 = vector.load %arg6[%c64, %c0_10] : memref<96x256xf32, #tpu.memory_space<vmem>>, vector<32x256xf32>
    %cst_11 = arith.constant dense<0.000000e+00> : vector<16x256xf32>
    %12 = tpu.matmul %10, %11, %cst_11 {dimension_numbers = #tpu.dot_dimension_numbers<[1], [0], [0], [1], [0, 0, 1, 1], [], []>} : vector<16x32xf32>, vector<32x256xf32>, vector<16x256xf32> -> vector<16x256xf32>
    %13 = arith.addf %9, %12 : vector<16x256xf32>
    %c0_12 = arith.constant 0 : index
    %c0_13 = arith.constant 0 : index
    %14 = vector.load %arg7[%c0_12, %c0_13] : memref<1x256xf32, #tpu.memory_space<vmem>>, vector<1x256xf32>
    %15 = vector.broadcast %14 : vector<1x256xf32> to vector<16x256xf32>
    %16 = arith.addf %13, %15 : vector<16x256xf32>
    %c0_14 = arith.constant 0 : index
    %c0_15 = arith.constant 0 : index
    %17 = vector.load %arg10[%c0_14, %c0_15] : memref<16x256xf32, #tpu.memory_space<vmem>>, vector<16x256xf32>
    tpu.vector_store %arg10[%c0_14, %c0_15], %16 {strides = array<i32>} : memref<16x256xf32, #tpu.memory_space<vmem>>, vector<16x256xf32>,
    %cst_16 = arith.constant dense<0xFF800000> : vector<16xf32>
    %18 = vector.multi_reduction <maximumf>, %16, %cst_16 [1] : vector<16x256xf32> to vector<16xf32>
    %19 = vector.shape_cast %18 : vector<16xf32> to vector<16x1xf32>
    %c0_17 = arith.constant 0 : index
    %c0_18 = arith.constant 0 : index
    %20 = vector.load %arg15[%c0_17, %c0_18] : memref<16x1xf32, #tpu.memory_space<vmem>>, vector<16x1xf32>
    %21 = arith.maximumf %20, %19 : vector<16x1xf32>
    %c0_19 = arith.constant 0 : index
    %c0_20 = arith.constant 0 : index
    %22 = vector.load %arg16[%c0_19, %c0_20] : memref<16x1xf32, #tpu.memory_space<vmem>>, vector<16x1xf32>
    %c0_21 = arith.constant 0 : index
    %c0_22 = arith.constant 0 : index
    %23 = vector.load %arg15[%c0_21, %c0_22] : memref<16x1xf32, #tpu.memory_space<vmem>>, vector<16x1xf32>
    %24 = arith.subf %23, %21 : vector<16x1xf32>
    %25 = math.exp %24 : vector<16x1xf32>
    %26 = arith.mulf %22, %25 : vector<16x1xf32>
    %27 = vector.broadcast %21 : vector<16x1xf32> to vector<16x256xf32>
    %28 = arith.subf %16, %27 : vector<16x256xf32>
    %29 = math.exp %28 : vector<16x256xf32>
    %cst_23 = arith.constant dense<0.000000e+00> : vector<16xf32>
    %30 = vector.multi_reduction <add>, %29, %cst_23 [1] : vector<16x256xf32> to vector<16xf32>
    %31 = vector.shape_cast %30 : vector<16xf32> to vector<16x1xf32>
    %32 = arith.addf %26, %31 : vector<16x1xf32>
    %c0_24 = arith.constant 0 : index
    %c0_25 = arith.constant 0 : index
    %33 = vector.load %arg16[%c0_24, %c0_25] : memref<16x1xf32, #tpu.memory_space<vmem>>, vector<16x1xf32>
    tpu.vector_store %arg16[%c0_24, %c0_25], %32 {strides = array<i32>} : memref<16x1xf32, #tpu.memory_space<vmem>>, vector<16x1xf32>,
    %c0_26 = arith.constant 0 : index
    %c0_27 = arith.constant 0 : index
    %34 = vector.load %arg15[%c0_26, %c0_27] : memref<16x1xf32, #tpu.memory_space<vmem>>, vector<16x1xf32>
    tpu.vector_store %arg15[%c0_26, %c0_27], %21 {strides = array<i32>} : memref<16x1xf32, #tpu.memory_space<vmem>>, vector<16x1xf32>,
    %c1_i32 = arith.constant 1 : i32
    %35 = arith.cmpi eq, %arg1, %c1_i32 : i32
    %36 = arith.extui %35 : i1 to i32
    %c0_i32_28 = arith.constant 0 : i32
    %37 = arith.cmpi ne, %36, %c0_i32_28 : i32
    scf.if %37 {
      %c0_29 = arith.constant 0 : index
      %c0_30 = arith.constant 0 : index
      %38 = vector.load %arg15[%c0_29, %c0_30] : memref<16x1xf32, #tpu.memory_space<vmem>>, vector<16x1xf32>
      %c0_31 = arith.constant 0 : index
      %c0_32 = arith.constant 0 : index
      %39 = vector.load %arg16[%c0_31, %c0_32] : memref<16x1xf32, #tpu.memory_space<vmem>>, vector<16x1xf32>
      %40 = math.log %39 : vector<16x1xf32>
      %41 = arith.addf %38, %40 : vector<16x1xf32>
      %c0_33 = arith.constant 0 : index
      %c0_34 = arith.constant 0 : index
      %42 = vector.load %arg13[%c0_33, %c0_34] : memref<16x1xf32, #tpu.memory_space<vmem>>, vector<16x1xf32>
      tpu.vector_store %arg13[%c0_33, %c0_34], %41 {strides = array<i32>} : memref<16x1xf32, #tpu.memory_space<vmem>>, vector<16x1xf32>,
    } else {
    }
    return
  }
  func.func @transform_0(%arg0: i32, %arg1: i32) -> (i32, i32) {
    %c0_i32 = arith.constant 0 : i32
    %c0_i32_0 = arith.constant 0 : i32
    return %arg0, %c0_i32 : i32, i32
  }
  func.func @transform_1(%arg0: i32, %arg1: i32) -> (i32, i32) {
    %c0_i32 = arith.constant 0 : i32
    %c0_i32_0 = arith.constant 0 : i32
    return %arg0, %c0_i32 : i32, i32
  }
  func.func @transform_2(%arg0: i32, %arg1: i32) -> (i32, i32, i32, i32) {
    %c0_i32 = arith.constant 0 : i32
    %c0_i32_0 = arith.constant 0 : i32
    %c0_i32_1 = arith.constant 0 : i32
    %c0_i32_2 = arith.constant 0 : i32
    return %arg0, %c0_i32, %c0_i32_0, %c0_i32_1 : i32, i32, i32, i32
  }
  func.func @transform_3(%arg0: i32, %arg1: i32) -> (i32, i32, i32) {
    %c0_i32 = arith.constant 0 : i32
    %c0_i32_0 = arith.constant 0 : i32
    %c0_i32_1 = arith.constant 0 : i32
    return %arg0, %c0_i32, %c0_i32_0 : i32, i32, i32
  }
  func.func @transform_4(%arg0: i32, %arg1: i32) -> (i32, i32) {
    %c0_i32 = arith.constant 0 : i32
    %c0_i32_0 = arith.constant 0 : i32
    return %c0_i32, %arg1 : i32, i32
  }
  func.func @transform_5(%arg0: i32, %arg1: i32) -> (i32, i32) {
    %c0_i32 = arith.constant 0 : i32
    %c0_i32_0 = arith.constant 0 : i32
    return %c0_i32, %arg1 : i32, i32
  }
  func.func @transform_6(%arg0: i32, %arg1: i32) -> (i32, i32) {
    %c0_i32 = arith.constant 0 : i32
    %c0_i32_0 = arith.constant 0 : i32
    %c0_i32_1 = arith.constant 0 : i32
    return %c0_i32, %c0_i32_0 : i32, i32
  }
  func.func @transform_7(%arg0: i32, %arg1: i32) -> (i32, i32) {
    %c0_i32 = arith.constant 0 : i32
    %c0_i32_0 = arith.constant 0 : i32
    %c0_i32_1 = arith.constant 0 : i32
    return %c0_i32, %c0_i32_0 : i32, i32
  }
  func.func @transform_8(%arg0: i32, %arg1: i32) -> (i32, i32) {
    %c0_i32 = arith.constant 0 : i32
    return %arg0, %arg1 : i32, i32
  }
  func.func @transform_9(%arg0: i32, %arg1: i32) -> (i32, i32, i32) {
    %c0_i32 = arith.constant 0 : i32
    %c0_i32_0 = arith.constant 0 : i32
    %c0_i32_1 = arith.constant 0 : i32
    return %arg0, %c0_i32, %c0_i32_0 : i32, i32, i32
  }
  func.func @transform_10(%arg0: i32, %arg1: i32) -> (i32, i32) {
    %c0_i32 = arith.constant 0 : i32
    %c0_i32_0 = arith.constant 0 : i32
    return %arg0, %c0_i32 : i32, i32
  }
  func.func @transform_11(%arg0: i32, %arg1: i32) -> (i32, i32) {
    %c0_i32 = arith.constant 0 : i32
    %c0_i32_0 = arith.constant 0 : i32
    return %arg0, %c0_i32 : i32, i32
  }
}

module attributes {stable_mosaic.version = 11 : i64} {
  func.func @_finalize_kernel(%arg0: i32, %arg1: i32, %arg2: memref<16x256xf32, #tpu.memory_space<vmem>>, %arg3: memref<16x1xf32, #tpu.memory_space<vmem>>, %arg4: memref<16x1xf32, #tpu.memory_space<vmem>>, %arg5: memref<2x8x16xf32, #tpu.memory_space<vmem>>, %arg6: memref<2x16x1xi32, #tpu.memory_space<vmem>>, %arg7: memref<16x256xf32, #tpu.memory_space<vmem>>) attributes {dimension_semantics = [#tpu.dimension_semantics<parallel>, #tpu.dimension_semantics<parallel>], iteration_bounds = array<i64: 1, 2>, scalar_prefetch = 0 : i64, scratch_operands = 0 : i64, tpu.core_type = #tpu.core_type<tc>, window_params = [{transform_indices = @transform_0, window_bounds = array<i64: 16, 256>}, {transform_indices = @transform_1, window_bounds = array<i64: 16, 1>}, {transform_indices = @transform_2, window_bounds = array<i64: 16, 1>}, {transform_indices = @transform_3, window_bounds = array<i64: 2, 8, 16>}, {transform_indices = @transform_4, window_bounds = array<i64: 2, 16, 1>}, {transform_indices = @transform_5, window_bounds = array<i64: 16, 256>}]} {
    %c256_i32 = arith.constant 256 : i32
    %0 = arith.muli %arg1, %c256_i32 : i32
    %c0 = arith.constant 0 : index
    %c0_0 = arith.constant 0 : index
    %1 = vector.load %arg4[%c0, %c0_0] : memref<16x1xf32, #tpu.memory_space<vmem>>, vector<16x1xf32>
    %c0_1 = arith.constant 0 : index
    %c0_2 = arith.constant 0 : index
    %2 = vector.load %arg2[%c0_1, %c0_2] : memref<16x256xf32, #tpu.memory_space<vmem>>, vector<16x256xf32>
    %c0_3 = arith.constant 0 : index
    %c0_4 = arith.constant 0 : index
    %3 = vector.load %arg3[%c0_3, %c0_4] : memref<16x1xf32, #tpu.memory_space<vmem>>, vector<16x1xf32>
    %4 = vector.broadcast %3 : vector<16x1xf32> to vector<16x256xf32>
    %5 = arith.subf %2, %4 : vector<16x256xf32>
    %6 = vector.broadcast %1 : vector<16x1xf32> to vector<16x256xf32>
    %7 = arith.mulf %6, %5 : vector<16x256xf32>
    %8 = tpu.iota {dimensions = array<i32: 2>} : vector<1x1x256xi32>
    %cst = arith.constant 0.000000e+00 : f32
    %9 = vector.broadcast %cst : f32 to vector<2x8x256xf32>
    %c0_5 = arith.constant 0 : index
    %c0_6 = arith.constant 0 : index
    %c0_7 = arith.constant 0 : index
    %10 = vector.load %arg6[%c0_5, %c0_6, %c0_7] : memref<2x16x1xi32, #tpu.memory_space<vmem>>, vector<2x16x1xi32>
    %11 = vector.broadcast %0 : i32 to vector<2x16x1xi32>
    %12 = arith.subi %10, %11 : vector<2x16x1xi32>
    %13 = vector.broadcast %12 : vector<2x16x1xi32> to vector<2x16x256xi32>
    %14 = vector.broadcast %8 : vector<1x1x256xi32> to vector<2x16x256xi32>
    %15 = arith.cmpi eq, %13, %14 : vector<2x16x256xi32>
    %16 = arith.extui %15 : vector<2x16x256xi1> to vector<2x16x256xi32>
    %17 = arith.sitofp %16 : vector<2x16x256xi32> to vector<2x16x256xf32>
    %c0_8 = arith.constant 0 : index
    %c0_9 = arith.constant 0 : index
    %c0_10 = arith.constant 0 : index
    %18 = vector.load %arg5[%c0_8, %c0_9, %c0_10] : memref<2x8x16xf32, #tpu.memory_space<vmem>>, vector<2x8x16xf32>
    "tpu.trace_start"() <{level = 10 : i32, message = "bts,bsv->btv"}> : () -> ()
    %cst_11 = arith.constant dense<0.000000e+00> : vector<2x8x256xf32>
    %19 = tpu.matmul %18, %17, %cst_11 {dimension_numbers = #tpu.dot_dimension_numbers<[2], [1], [1], [2], [0, 0, 0, 1, 1, 2], [0], [0]>} : vector<2x8x16xf32>, vector<2x16x256xf32>, vector<2x8x256xf32> -> vector<2x8x256xf32>
    "tpu.trace_stop"() : () -> ()
    %20 = arith.addf %9, %19 : vector<2x8x256xf32>
    %21 = vector.shape_cast %20 : vector<2x8x256xf32> to vector<16x256xf32>
    %22 = arith.addf %7, %21 : vector<16x256xf32>
    %c0_12 = arith.constant 0 : index
    %c0_13 = arith.constant 0 : index
    %23 = vector.load %arg7[%c0_12, %c0_13] : memref<16x256xf32, #tpu.memory_space<vmem>>, vector<16x256xf32>
    tpu.vector_store %arg7[%c0_12, %c0_13], %22 {strides = array<i32>} : memref<16x256xf32, #tpu.memory_space<vmem>>, vector<16x256xf32>,
    return
  }
  func.func @transform_0(%arg0: i32, %arg1: i32) -> (i32, i32) {
    %c0_i32 = arith.constant 0 : i32
    return %arg0, %arg1 : i32, i32
  }
  func.func @transform_1(%arg0: i32, %arg1: i32) -> (i32, i32) {
    %c0_i32 = arith.constant 0 : i32
    %c0_i32_0 = arith.constant 0 : i32
    return %arg0, %c0_i32 : i32, i32
  }
  func.func @transform_2(%arg0: i32, %arg1: i32) -> (i32, i32) {
    %c0_i32 = arith.constant 0 : i32
    %c0_i32_0 = arith.constant 0 : i32
    return %arg0, %c0_i32 : i32, i32
  }
  func.func @transform_3(%arg0: i32, %arg1: i32) -> (i32, i32, i32) {
    %c0_i32 = arith.constant 0 : i32
    %c0_i32_0 = arith.constant 0 : i32
    %c0_i32_1 = arith.constant 0 : i32
    return %arg0, %c0_i32, %c0_i32_0 : i32, i32, i32
  }
  func.func @transform_4(%arg0: i32, %arg1: i32) -> (i32, i32, i32) {
    %c0_i32 = arith.constant 0 : i32
    %c0_i32_0 = arith.constant 0 : i32
    %c0_i32_1 = arith.constant 0 : i32
    return %arg0, %c0_i32, %c0_i32_0 : i32, i32, i32
  }
  func.func @transform_5(%arg0: i32, %arg1: i32) -> (i32, i32) {
    %c0_i32 = arith.constant 0 : i32
    return %arg0, %arg1 : i32, i32
  }
}

</mosaic_0001>

<bundles_post_ra>
// kernel: word_prob_layer.3
= control target key start
LH: loop header
LB: loop body
LE: loop exit
PB: predicated region body
PF: predicated region fallthrough
CT: control target
= control target key end

     0   :  { %s928_s18 = smov 0   ;;  %s930_s19 = smov 0   ;;  %s1031_s0 = inlined_call_operand.vmem [shape: f32[16,512], index: 0, kind: input, shape index: {}, may-alias: {0,5}]   ;;  %s1032_s1 = inlined_call_operand.vmem [shape: f32[16,1], index: 1, kind: input, shape index: {}]   ;;  %s1033_s2 = inlined_call_operand.vmem [shape: f32[16,1], index: 2, kind: input, shape index: {}]   ;;  %s1034_s3 = inlined_call_operand.vmem [shape: f32[2,8,16], index: 3, kind: input, shape index: {}]   ;;  %s1035_s4 = inlined_call_operand.vmem [shape: s32[2,16,1], index: 4, kind: input, shape index: {}]   ;;  %s1036_s5 = inlined_call_operand.vmem [shape: f32[16,512], index: 5, kind: output, shape index: {}, may-alias: {0,5}]  }
   0x1   :  { %s932_s20 = smov 0   ;;  %s934_s21 = smov 0  }
   0x2   :  { %s936_s22 = smov 0  }
   0x3 LB: > { %s24_s23 = sadd.s32 1, %s889_s21  ;;  %s770_s24 = sadd.s32 4294967295, %s893_s22   ;;  %s893_s22 = sphi %s936_s22, %s15_s22   ;;  %s889_s21 = sphi %s934_s21, %s1041_s21   ;;  %s885_s20 = sphi %s932_s20, %s1040_s20   ;;  %s881_s19 = sphi %s930_s19, %s1039_s19   ;;  %s877_s18 = sphi %s928_s18, %s1038_s18  }
   0x4   : > { %p25_p0 = scmp.ge.s32.totalorder %s24_s23, 2  ;;  %p43_p1 = scmp.ne.s32.totalorder %s881_s19, %s877_s18 }
   0x5   : > { %p44_p2 = scmp.eq.s32.totalorder %s893_s22, 0  ;;  %p179_p4 = scmp.eq.s32.totalorder %s770_s24, 1 }
   0x6   : > { %s1043_s23 = smov (%p25_p0, %s24_s23), 0  ;;  %s36_s26 = sadd.s32 1, %s881_s19 }
   0x7   : > { %p45_p3 = por %p44_p2, %p43_p1  ;;  %s32_s25 = ssub.s32 %s889_s21, %s1043_s23 }
   0x8   : > { %p34_p5 = scmp.eq.s32.totalorder %s32_s25, 0  ;;  %p963_p6 = por %p179_p4, %p43_p1 }
   0x9   : > { %p777_p7 = scmp.ge.s32.totalorder %s893_s22, 2 }
   0xa   : > { %s968_s28 = scalar_select %p34_p5, %s881_s19, %s36_s26  }
   0xb   : > { %238 = sbr.rel (%p777_p7) target bundleno = 22 (0x16), region = 32 }
  0x10   : > { %241 = sbr.rel (!%p45_p3) target bundleno = 22 (0x16), region = 36  ;;  %s243_s29 = sand.u32 (%p45_p3), 1, %s881_s19  }
  0x11   : > { %s808_s30 = sshll.u32 (%p45_p3), %s889_s21, 4  ;;  %s778_s6 = sshll.u32 (%p45_p3), %s243_s29, 5 }
  0x12   : > { %s251_s9 = scalar_lea.vmem (%p45_p3), %s1031_s0, %s808_s30  ;;  %s245_s10 = scalar_lea.vmem (%p45_p3), [#allocation2], %s778_s6 }
  0x13   : > { %v264_v0 = vld [vmem:[%s251_s9] sm:$0xff] (%p45_p3)  ;;  %v266_v1 = vld [vmem:[%s251_s9 + $0x8] sm:$0xff] (%p45_p3) }
  0x14   : > { %v268_v2 = vld [vmem:[%s251_s9 + $0x20] sm:$0xff] (%p45_p3)  ;;  %265 = vst [vmem:[%s245_s10] sm:$0xff] (%p45_p3), %v264_v0  ;;  %267 = vst [vmem:[%s245_s10 + $0x8] sm:$0xff] (%p45_p3), %v266_v1  ;;  %v270_v3 = vld [vmem:[%s251_s9 + $0x28] sm:$0xff] (%p45_p3) }
  0x15   : > { %269 = vst [vmem:[%s245_s10 + $0x10] sm:$0xff] %v268_v2  ;;  %271 = vst [vmem:[%s245_s10 + $0x18] sm:$0xff] %v270_v3 }
  0x16 PF: > { %p781_p8 = scmp.ge.s32.totalorder %s893_s22, 1  ;;  %p276_p9 = scmp.lt.s32.totalorder %s893_s22, 3 }
  0x18   : > { %p277_p10 = pnand %p781_p8, %p276_p9 }
  0x19   : > { %s784_s11 = sshll.u32 (!%p277_p10), %s885_s20, 8  ;;  %s283_s15 = sand.u32 (!%p277_p10), 1, %s877_s18  }
  0x1a   : > { %280 = sbr.rel (%p277_p10) target bundleno = 373 (0x175), region = 59  ;;  %s782_s16 = sshll.u32 (!%p277_p10), %s283_s15, 5 }
  0x1b   : > { %s285_s17 = scalar_lea.vmem (!%p277_p10), [#allocation2], %s782_s16  ;;  %s329_s18 = scalar_lea.vmem (!%p277_p10), [#allocation3], %s782_s16 }
  0x1f   : > { %v400_v4 = vld [vmem:[%s1035_s4 + $0x8] sm:$0xff]  ;;  %v399_v5 = vld [vmem:[%s1035_s4] sm:$0xff]  ;;  %v895_v6 = vmov 0   ;;  %v403_v7 = vstv %s784_s11  ;;  %v402_v8 = vld [vmem:[%s1035_s4 + $0x18] sm:$0xff]  ;;  %v896_v14 = vmov 0.0   ;;  %v396_v19 = vlaneseq  ;;  %s809_s24 = sshll.u32 (%p963_p6), %s885_s20, 4 }
  0x20   : > { %854 = vset.pattern.permute.xlu1 %v895_v6  ;;  %853 = vset.pattern.permute.xlu0 %v895_v6  ;;  %v401_v9 = vld [vmem:[%s1035_s4 + $0x10] sm:$0xff]  ;;  %v405_v10 = vsub.s32 %v400_v4, %v403_v7  ;;  %v404_v11 = vsub.s32 %v399_v5, %v403_v7  ;;  %v407_v12 = vsub.s32 %v402_v8, %v403_v7  ;;  %v366_v15 = vld [vmem:[%s1032_s1] sm:$0xff]  ;;  %v367_v16 = vld [vmem:[%s1032_s1 + $0x8] sm:$0xff]  ;;  %v897_v24 = vmov 1.0   ;;  %s615_s29 = scalar_lea.vmem (%p963_p6), %s1036_s5, %s809_s24 }
  0x21   : > { %v406_v13 = vsub.s32 %v401_v9, %v403_v7  ;;  %514 = vmatprep.mubr.f32.mxu0 %v896_v14  ;;  %588 = vmatprep.mubr.f32.mxu1 %v896_v14  ;;  %v360_v17 = vld [vmem:[%s1033_s2] sm:$0xff]  ;;  %v361_v18 = vld [vmem:[%s1033_s2 + $0x8] sm:$0xff]  ;;  %v397_v20 = vand.u32 127, %v396_v19  ;;  %vm446_vm4 = vcmask 130048   ;;  %v364_v35 = vld [vmem:[%s285_s17 + $0x10] sm:$0xff] }
  0x22   : > { %412 = vperm.xlu0 %853, %v405_v10   ;;  %409 = vperm.xlu1 %854, %v404_v11   ;;  %v444_v25 = vld [vmem:[%s1034_s3] sm:$0xff]  ;;  %v445_v28 = vld [vmem:[%s1034_s3 + $0x8] sm:$0xff]  ;;  %v365_v38 = vld [vmem:[%s285_s17 + $0x18] sm:$0xff] }
  0x23   : > { %v398_v21 = vadd.s32 128, %v397_v20  ;;  %v362_v30 = vld [vmem:[%s285_s17] sm:$0xff]  ;;  %v363_v32 = vld [vmem:[%s285_s17 + $0x8] sm:$0xff] }
  0x26   : > { %418 = vperm.xlu0 %853, %v407_v12   ;;  %415 = vperm.xlu1 %854, %v406_v13  }
  0x2a   : > { %370 = vperm.xlu0 %853, %v366_v15   ;;  %375 = vperm.xlu1 %854, %v367_v16  }
  0x2e   : > { %384 = vperm.xlu0 %853, %v360_v17   ;;  %389 = vperm.xlu1 %854, %v361_v18  }
  0x9d   : > { %v413_v22 = vpop.permute.xlu0 %412  ;;  %v410_v23 = vpop.permute.xlu1 %409 }
  0x9e   : > { %vm421_vm0 = vcmp.eq.s32.totalorder %v410_v23, %v398_v21  ;;  %vm423_vm1 = vcmp.eq.s32.totalorder %v413_v22, %v398_v21  ;;  %vm422_vm2 = vcmp.eq.s32.totalorder %v413_v22, %v397_v20  ;;  %vm420_vm3 = vcmp.eq.s32.totalorder %v410_v23, %v397_v20 }
  0x9f   : > { %793 = vmatprep.subr.msk.mxu0 %vm423_vm1, %v897_v24 }
  0xa0   : > { %794 = vmatpush1.msk.msra.mxu0 %vm422_vm2, %v897_v24 }
  0xa1   : > { %v419_v26 = vpop.permute.xlu0 %418  ;;  %795 = vmatprep.subr.msk.mxu0 %vm421_vm0, %v897_v24  ;;  %v416_v27 = vpop.permute.xlu1 %415 }
  0xa2   : > { %796 = vmatpush1.msk.msra.mxu0 %vm420_vm3, %v897_v24  ;;  %vm427_vm5 = vcmp.eq.s32.totalorder %v419_v26, %v398_v21  ;;  %vm426_vm6 = vcmp.eq.s32.totalorder %v419_v26, %v397_v20  ;;  %vm425_vm7 = vcmp.eq.s32.totalorder %v416_v27, %v398_v21  ;;  %vm424_vm8 = vcmp.eq.s32.totalorder %v416_v27, %v397_v20 }
  0xa3   : > { %797 = vmatmul.mubr.msk.f32.vlgmr.msra.gmra.mxu0 %vm446_vm4, %v444_v25  ;;  %798 = vmatprep.subr.msk.mxu1 %vm427_vm5, %v897_v24 }
  0xa4   : > { %799 = vmatpush1.msk.msra.mxu1 %vm426_vm6, %v897_v24 }
  0xa5   : > { %800 = vmatprep.subr.msk.mxu1 %vm425_vm7, %v897_v24  ;;  %v371_v29 = vpop.permute.xlu0 %370  ;;  %v376_v31 = vpop.permute.xlu1 %375 }
  0xa6   : > { %801 = vmatpush1.msk.msra.mxu1 %vm424_vm8, %v897_v24  ;;  %v378_v34 = vsub.f32 %v362_v30, %v371_v29  ;;  %v379_v36 = vsub.f32 %v363_v32, %v371_v29  ;;  %v380_v41 = vsub.f32 %v364_v35, %v376_v31  ;;  %v381_v45 = vsub.f32 %v365_v38, %v376_v31 }
  0xa7   : > { %802 = vmatmul.mubr.msk.f32.vlgmr.msra.gmra.mxu1 %vm446_vm4, %v445_v28 }
  0xa9   : > { %v385_v33 = vpop.permute.xlu0 %384  ;;  %v390_v39 = vpop.permute.xlu1 %389 }
  0xaa   : > { %v392_v37 = vmul.f32 %v385_v33, %v378_v34  ;;  %v393_v42 = vmul.f32 %v385_v33, %v379_v36  ;;  %v394_v46 = vmul.f32 %v390_v39, %v380_v41  ;;  %v395_v49 = vmul.f32 %v390_v39, %v381_v45 }
 0x163   : > { %v516_v40 = vpop.f32.mrf.mxu0 }
 0x164   : > { %v595_v43 = vadd.f32 %v516_v40, %v392_v37 }
 0x165   : > { %v518_v44 = vpop.f32.mrf.mxu0 }
 0x166   : > { %599 = vst [vmem:[%s329_s18] sm:$0xff] %v595_v43  ;;  %v596_v47 = vadd.f32 %v518_v44, %v393_v42 }
 0x167   : > { %v590_v48 = vpop.f32.mrf.mxu1 }
 0x168   : > { %600 = vst [vmem:[%s329_s18 + $0x8] sm:$0xff] %v596_v47  ;;  %v597_v50 = vadd.f32 %v590_v48, %v394_v46  ;;  %609 = sbr.rel (!%p963_p6) target bundleno = 373 (0x175), region = 67 }
 0x169   : > { %v592_v51 = vpop.f32.mrf.mxu1 }
 0x16a   : > { %601 = vst [vmem:[%s329_s18 + $0x10] sm:$0xff] %v597_v50  ;;  %v598_v52 = vadd.f32 %v592_v51, %v395_v49 }
 0x16c   : > { %602 = vst [vmem:[%s329_s18 + $0x18] sm:$0xff] %v598_v52 }
 0x16d   : > { %v628_v53 = vld [vmem:[%s329_s18] sm:$0xff] }
 0x16e   : > { %629 = vst [vmem:[%s615_s29] sm:$0xff] %v628_v53 }
 0x16f   : > { %v630_v54 = vld [vmem:[%s329_s18 + $0x8] sm:$0xff] }
 0x170   : > { %631 = vst [vmem:[%s615_s29 + $0x8] sm:$0xff] %v630_v54 }
 0x171   : > { %v632_v55 = vld [vmem:[%s329_s18 + $0x10] sm:$0xff] }
 0x172   : > { %633 = vst [vmem:[%s615_s29 + $0x20] sm:$0xff] %v632_v55 }
 0x173   : > { %v634_v56 = vld [vmem:[%s329_s18 + $0x18] sm:$0xff] }
 0x174   : > { %635 = vst [vmem:[%s615_s29 + $0x28] sm:$0xff] %v634_v56 }
 0x175 PF: > { %s15_s22 = sadd.s32 1, %s893_s22   ;;  %s1038_s18 = smov %s881_s19 }
 0x176   : > { %p12_p11 = scmp.ge.s32.totalorder %s15_s22, 4   ;;  %s1039_s19 = smov %s968_s28 }
 0x177   : > { %s1040_s20 = smov %s889_s21  ;;  %s1041_s21 = smov %s1043_s23 }
 0x178   :  { %14 = sbr.rel (!%p12_p11) target bundleno = 3 (0x3), region = 133 }

// kernel: word_prob_layer.2
= control target key start
LH: loop header
LB: loop body
LE: loop exit
PB: predicated region body
PF: predicated region fallthrough
CT: control target
= control target key end

     0   :  { %s2365_s0 = inlined_call_operand.vmem [shape: f32[16,32], index: 0, kind: input, shape index: {}]   ;;  %s2366_s1 = inlined_call_operand.vmem [shape: f32[16,32], index: 1, kind: input, shape index: {}]   ;;  %s2367_s2 = inlined_call_operand.vmem [shape: f32[2,4,8,16], index: 2, kind: input, shape index: {}]   ;;  %s2368_s3 = inlined_call_operand.vmem [shape: f32[2,16,32], index: 3, kind: input, shape index: {}]   ;;  %s2369_s4 = inlined_call_operand.vmem [shape: f32[96,512], index: 4, kind: input, shape index: {}]   ;;  %s2370_s5 = inlined_call_operand.vmem [shape: f32[1,512], index: 5, kind: input, shape index: {}]   ;;  %s2371_s6 = inlined_call_operand.vmem [shape: f32[96,1], index: 6, kind: input, shape index: {}]   ;;  %s2372_s7 = inlined_call_operand.<no memory space> [shape: f32[1,1], index: 7, kind: input, shape index: {}]   ;;  %s2373_s8 = inlined_call_operand.vmem [shape: f32[16,512], index: 8, kind: output, shape index: {0}]   ;;  %s2374_s9 = inlined_call_operand.vmem [shape: f32[2,8,16], index: 9, kind: output, shape index: {1}]   ;;  %s2375_s10 = inlined_call_operand.vmem [shape: f32[16,1], index: 10, kind: output, shape index: {2}]   ;;  %s2376_s11 = inlined_call_operand.vmem [shape: f32[16,1], index: 11, kind: output, shape index: {3}]  }
   0x1   :  { %2377 = sst [smem:[#allocation8_spill]] %s2369_s4 }
   0x2   :  { %17 = sst [smem:[#allocation5]] %s2372_s7 }
   0x3   :  { %s2029_s19 = smov 0   ;;  %s2031_s20 = smov 0  }
   0x4   :  { %s2033_s21 = smov 0   ;;  %s2035_s22 = smov 0  }
   0x5   :  { %s2037_s23 = smov 0  }
   0x6 LB: > { %s32_s7 = sadd.s32 1, %s1955_s22  ;;  %s1725_s24 = sadd.s32 4294967295, %s1959_s23   ;;  %s1959_s23 = sphi %s2037_s23, %s23_s23   ;;  %s1955_s22 = sphi %s2035_s22, %s2383_s22   ;;  %s1951_s21 = sphi %s2033_s21, %s2382_s21   ;;  %s1947_s20 = sphi %s2031_s20, %s2381_s20   ;;  %s1943_s19 = sphi %s2029_s19, %s2380_s19  }
   0x7   : > { %p33_p0 = scmp.ge.s32.totalorder %s32_s7, 2  ;;  %p153_p1 = scmp.ne.s32.totalorder %s1947_s20, %s1943_s19 }
   0x8   : > { %p154_p2 = scmp.eq.s32.totalorder %s1959_s23, 0  ;;  %p253_p4 = scmp.eq.s32.totalorder %s1725_s24, 1 }
   0x9   : > { %s2385_s7 = smov (%p33_p0, %s32_s7), 0  ;;  %s146_s26 = sadd.s32 1, %s1947_s20 }
   0xa   : > { %p155_p3 = por %p154_p2, %p153_p1  ;;  %s143_s25 = ssub.s32 %s1955_s22, %s2385_s7 }
   0xb   : > { %p144_p5 = scmp.eq.s32.totalorder %s143_s25, 0  ;;  %p2064_p6 = por %p253_p4, %p153_p1 }
   0xc   : > { %p1732_p7 = scmp.ge.s32.totalorder %s1959_s23, 2 }
   0xd   : > { %s2069_s28 = scalar_select %p144_p5, %s1947_s20, %s146_s26  }
   0xe   : > { %397 = sbr.rel (%p1732_p7) target bundleno = 41 (0x29), region = 40 }
  0x13   : > { %400 = sbr.rel (!%p155_p3) target bundleno = 41 (0x29), region = 44  ;;  %s402_s29 = sand.u32 (%p155_p3), 1, %s1947_s20  }
  0x14   : > { %s1767_s30 = sshll.u32 (%p155_p3), %s1955_s22, 4  ;;  %s1848_s12 = smul.u32 (%p155_p3), 192, %s402_s29 }
  0x15   : > { %s2379_s4 = sld [smem:[#allocation8_spill]] (%p155_p3) }
  0x16   : > { %s2085_s16 = scalar_lea.vmem (%p155_p3), [#allocation6], %s1848_s12 }
  0x1b   : > { %s2077_s15 = scalar_lea.vmem %s2379_s4, %s1767_s30 }
  0x1c   : > { %v420_v0 = vld [vmem:[%s2077_s15] sm:$0xff]  ;;  %v422_v1 = vld [vmem:[%s2077_s15 + $0x8] sm:$0xff] }
  0x1d   : > { %v424_v2 = vld [vmem:[%s2077_s15 + $0x20] sm:$0xff]  ;;  %v426_v3 = vld [vmem:[%s2077_s15 + $0x28] sm:$0xff]  ;;  %421 = vst [vmem:[%s2085_s16] sm:$0xff] %v420_v0  ;;  %423 = vst [vmem:[%s2085_s16 + $0x8] sm:$0xff] %v422_v1 }
  0x1e   : > { %v428_v4 = vld [vmem:[%s2077_s15 + $0x40] sm:$0xff]  ;;  %v430_v5 = vld [vmem:[%s2077_s15 + $0x48] sm:$0xff]  ;;  %425 = vst [vmem:[%s2085_s16 + $0x10] sm:$0xff] %v424_v2  ;;  %427 = vst [vmem:[%s2085_s16 + $0x18] sm:$0xff] %v426_v3 }
  0x1f   : > { %429 = vst [vmem:[%s2085_s16 + $0x20] sm:$0xff] %v428_v4  ;;  %431 = vst [vmem:[%s2085_s16 + $0x28] sm:$0xff] %v430_v5  ;;  %v432_v6 = vld [vmem:[%s2077_s15 + $0x60] sm:$0xff]  ;;  %v434_v7 = vld [vmem:[%s2077_s15 + $0x68] sm:$0xff] }
  0x20   : > { %v436_v8 = vld [vmem:[%s2077_s15 + $0x80] sm:$0xff]  ;;  %433 = vst [vmem:[%s2085_s16 + $0x30] sm:$0xff] %v432_v6  ;;  %435 = vst [vmem:[%s2085_s16 + $0x38] sm:$0xff] %v434_v7  ;;  %v438_v9 = vld [vmem:[%s2077_s15 + $0x88] sm:$0xff] }
  0x21   : > { %437 = vst [vmem:[%s2085_s16 + $0x40] sm:$0xff] %v436_v8  ;;  %v440_v10 = vld [vmem:[%s2077_s15 + $0xa0] sm:$0xff]  ;;  %v442_v11 = vld [vmem:[%s2077_s15 + $0xa8] sm:$0xff]  ;;  %439 = vst [vmem:[%s2085_s16 + $0x48] sm:$0xff] %v438_v9 }
  0x22   : > { %441 = vst [vmem:[%s2085_s16 + $0x50] sm:$0xff] %v440_v10  ;;  %443 = vst [vmem:[%s2085_s16 + $0x58] sm:$0xff] %v442_v11  ;;  %v444_v12 = vld [vmem:[%s2077_s15 + $0xc0] sm:$0xff]  ;;  %v446_v13 = vld [vmem:[%s2077_s15 + $0xc8] sm:$0xff] }
  0x23   : > { %v448_v14 = vld [vmem:[%s2077_s15 + $0xe0] sm:$0xff]  ;;  %445 = vst [vmem:[%s2085_s16 + $0x60] sm:$0xff] %v444_v12  ;;  %447 = vst [vmem:[%s2085_s16 + $0x68] sm:$0xff] %v446_v13  ;;  %v450_v15 = vld [vmem:[%s2077_s15 + $0xe8] sm:$0xff] }
  0x24   : > { %449 = vst [vmem:[%s2085_s16 + $0x70] sm:$0xff] %v448_v14  ;;  %v452_v16 = vld [vmem:[%s2077_s15 + $0x100] sm:$0xff]  ;;  %v454_v17 = vld [vmem:[%s2077_s15 + $0x108] sm:$0xff]  ;;  %451 = vst [vmem:[%s2085_s16 + $0x78] sm:$0xff] %v450_v15 }
  0x25   : > { %453 = vst [vmem:[%s2085_s16 + $0x80] sm:$0xff] %v452_v16  ;;  %455 = vst [vmem:[%s2085_s16 + $0x88] sm:$0xff] %v454_v17  ;;  %v456_v18 = vld [vmem:[%s2077_s15 + $0x120] sm:$0xff]  ;;  %v458_v19 = vld [vmem:[%s2077_s15 + $0x128] sm:$0xff] }
  0x26   : > { %v460_v20 = vld [vmem:[%s2077_s15 + $0x140] sm:$0xff]  ;;  %457 = vst [vmem:[%s2085_s16 + $0x90] sm:$0xff] %v456_v18  ;;  %459 = vst [vmem:[%s2085_s16 + $0x98] sm:$0xff] %v458_v19  ;;  %v462_v21 = vld [vmem:[%s2077_s15 + $0x148] sm:$0xff] }
  0x27   : > { %461 = vst [vmem:[%s2085_s16 + $0xa0] sm:$0xff] %v460_v20  ;;  %v464_v22 = vld [vmem:[%s2077_s15 + $0x160] sm:$0xff]  ;;  %v466_v23 = vld [vmem:[%s2077_s15 + $0x168] sm:$0xff]  ;;  %463 = vst [vmem:[%s2085_s16 + $0xa8] sm:$0xff] %v462_v21 }
  0x28   : > { %465 = vst [vmem:[%s2085_s16 + $0xb0] sm:$0xff] %v464_v22  ;;  %467 = vst [vmem:[%s2085_s16 + $0xb8] sm:$0xff] %v466_v23 }
  0x29 PF: > { %p1735_p8 = scmp.ge.s32.totalorder %s1959_s23, 1  ;;  %p480_p9 = scmp.lt.s32.totalorder %s1959_s23, 3 }
  0x2b   : > { %p481_p10 = pnand %p1735_p8, %p480_p9 }
  0x2c   : > { %s487_s17 = sand.u32 (!%p481_p10), 1, %s1943_s19   ;;  %s1737_s18 = sshll.u32 (!%p481_p10), %s1951_s21, 1 }
  0x2d   : > { %484 = sbr.rel (%p481_p10) target bundleno = 1177 (0x499), region = 71  ;;  %s1736_s25 = sshll.u32 (!%p481_p10), %s487_s17, 5 }
  0x2e   : > { %s1849_s24 = smul.u32 (!%p481_p10), 192, %s487_s17  ;;  %p594_p11 = scmp.lt.s32.totalorder (!%p481_p10), %s1737_s18, 3 }
  0x2f   : > { %s2141_s13 = scalar_lea.vmem (!%p481_p10), [#allocation7], %s1736_s25  ;;  %p1738_p12 = scmp.ne.s32.totalorder (!%p481_p10), %s1951_s21, 0 }
  0x30   : > { %s2139_s12 = scalar_lea.vmem (!%p481_p10), [#allocation6], %s1849_s24 }
  0x32   : > { %s2387_s18 = smov (!%p594_p11, %s1737_s18), 3  ;;  %621 = sbr.rel (%p1738_p12) target bundleno = 493 (0x1ed), region = 79 }
  0x33   : > { %s596_s30 = scalar_lea.vmem %s2370_s5, %s2387_s18  ;;  %s1061_s14 = sld [smem:[#allocation5]] (!%p1738_p12) }
  0x37   : > { %v648_v24 = vld [vmem:[%s2368_s3 + $0x8] sm:$0xff]  ;;  %v647_v25 = vld [vmem:[%s2368_s3] sm:$0xff]  ;;  %vm630_vm0 = vcmask 130048   ;;  %v1961_v27 = vmov 0.0   ;;  %vm1962_vm1 = vmmov 0   ;;  %v624_v29 = vld [vmem:[%s2367_s2 + $0x10] sm:$0xff] }
  0x38   : > { %v622_v26 = vld [vmem:[%s2367_s2] sm:$0xff]  ;;  %1793 = vmatprep.subr.mxu1 %v1961_v27  ;;  %1797 = vmatprep.mubr.msk.f32.mxu1 %vm1962_vm1, %v1961_v27  ;;  %v623_v28 = vld [vmem:[%s2367_s2 + $0x8] sm:$0xff]  ;;  %v625_v30 = vld [vmem:[%s2367_s2 + $0x18] sm:$0xff]  ;;  %v634_v33 = vsel %vm630_vm0, %v624_v29, 0.0  ;;  %vm797_vm2 = vcmask 261120   ;;  %vm1077_vm3 = vcmask 7168  }
  0x39   : > { %v631_v31 = vsel %vm630_vm0, %v622_v26, 0.0  ;;  %1794 = vmatpush3.msra.mxu1 %v648_v24  ;;  %v632_v32 = vsel %vm630_vm0, %v623_v28, 0.0  ;;  %v626_v34 = vld [vmem:[%s2367_s2 + $0x20] sm:$0xff]  ;;  %v627_v36 = vld [vmem:[%s2367_s2 + $0x28] sm:$0xff]  ;;  %v628_v37 = vld [vmem:[%s2367_s2 + $0x30] sm:$0xff]  ;;  %v636_v40 = vsel %vm630_vm0, %v625_v30, 0.0  ;;  %v1062_v14 = vstv %s1061_s14 }
  0x3a   : > { %1795 = vmatprep.subr.mxu1 %v1961_v27  ;;  %v633_v35 = vadd.f32 %v632_v32, %v631_v31  ;;  %v629_v38 = vld [vmem:[%s2367_s2 + $0x38] sm:$0xff]  ;;  %v638_v39 = vsel %vm630_vm0, %v626_v34, 0.0  ;;  %v639_v41 = vsel %vm630_vm0, %v627_v36, 0.0  ;;  %v641_v42 = vsel %vm630_vm0, %v628_v37, 0.0  ;;  %v810_v44 = vld [vmem:[%s2371_s6 + $0x30] sm:$0xff]  ;;  %v809_v48 = vld [vmem:[%s2371_s6 + $0x28] sm:$0xff] }
  0x3b   : > { %1796 = vmatpush3.msra.mxu1 %v647_v25  ;;  %v811_v43 = vld [vmem:[%s2371_s6 + $0x38] sm:$0xff]  ;;  %v640_v46 = vadd.f32 %v639_v41, %v638_v39  ;;  %v643_v47 = vsel %vm630_vm0, %v629_v38, 0.0  ;;  %v806_v49 = vld [vmem:[%s2366_s1] sm:$0xff]  ;;  %v649_v53 = vld [vmem:[%s2368_s3 + $0x10] sm:$0xff]  ;;  %1082 = vst.msk [vmem:[#allocation4] sm:$0xff] %vm1077_vm3, %v1961_v27  ;;  %v1963_v7 = vmov -inf  }
  0x3c   : > { %1800 = vmatprep.subr.mxu1 %v1961_v27  ;;  %v635_v45 = vadd.f32 %v634_v33, %v633_v35  ;;  %1807 = vmatprep.subr.mxu0 %v811_v43  ;;  %v650_v51 = vld [vmem:[%s2368_s3 + $0x18] sm:$0xff]  ;;  %v808_v55 = vld [vmem:[%s2371_s6 + $0x20] sm:$0xff]  ;;  %v804_v57 = vld [vmem:[%s2371_s6 + $0x10] sm:$0xff]  ;;  %1083 = vst.msk [vmem:[#allocation4 + $0x8] sm:$0xff] %vm1077_vm3, %v1961_v27 }
  0x3d   : > { %1808 = vmatpush3.msra.mxu0 %v811_v43  ;;  %v642_v52 = vadd.f32 %v641_v42, %v640_v46  ;;  %1815 = vmatprep.mubr.msk.f32.mxu0 %vm797_vm2, %v806_v49  ;;  %v805_v56 = vld [vmem:[%s2371_s6 + $0x18] sm:$0xff]  ;;  %v800_v58 = vld [vmem:[%s2365_s0] sm:$0xff]  ;;  %v807_v59 = vld [vmem:[%s2366_s1 + $0x8] sm:$0xff]  ;;  %1080 = vst.msk [vmem:[#allocation3] sm:$0xff] %vm1077_vm3, %v1963_v7 }
  0x3e   : > { %v637_v50 = vadd.f32 %v636_v40, %v635_v45  ;;  %1809 = vmatprep.subr.mxu0 %v810_v44  ;;  %v803_v60 = vld [vmem:[%s2371_s6 + $0x8] sm:$0xff]  ;;  %v977_v61 = vld [vmem:[%s2371_s6 + $0x58] sm:$0xff]  ;;  %v802_v62 = vld [vmem:[%s2371_s6] sm:$0xff]  ;;  %1081 = vst.msk [vmem:[#allocation3 + $0x8] sm:$0xff] %vm1077_vm3, %v1963_v7 }
  0x3f   : > { %1810 = vmatpush3.msra.mxu0 %v810_v44  ;;  %v644_v54 = vadd.f32 %v643_v47, %v642_v52  ;;  %v976_v63 = vld [vmem:[%s2371_s6 + $0x50] sm:$0xff]  ;;  %v801_v0 = vld [vmem:[%s2365_s0 + $0x8] sm:$0xff]  ;;  %v974_v2 = vld [vmem:[%s2371_s6 + $0x40] sm:$0xff] }
  0x40   : > { %645 = vst.msk [vmem:[%s2374_s9] sm:$0xff] %vm630_vm0, %v637_v50  ;;  %1798 = vmatmul.mubr.msk.f32.vlgmr.msra.gmra.mxu1 %vm630_vm0, %v637_v50  ;;  %1811 = vmatprep.subr.mxu0 %v809_v48  ;;  %v975_v1 = vld [vmem:[%s2371_s6 + $0x48] sm:$0xff] }
  0x41   : > { %1801 = vmatpush3.msra.mxu1 %v650_v51  ;;  %1804 = vmatprep.mubr.msk.f32.mxu1 %vm1962_vm1, %v1961_v27  ;;  %646 = vst.msk [vmem:[%s2374_s9 + $0x8] sm:$0xff] %vm630_vm0, %v644_v54 }
  0x42   : > { %1802 = vmatprep.subr.mxu1 %v1961_v27  ;;  %1812 = vmatpush3.msra.mxu0 %v809_v48 }
  0x43   : > { %1803 = vmatpush3.msra.mxu1 %v649_v53  ;;  %1813 = vmatprep.subr.mxu0 %v808_v55 }
  0x44   : > { %1805 = vmatmul.mubr.msk.f32.vlgmr.msra.gmra.mxu1 %vm630_vm0, %v644_v54  ;;  %1818 = vmatprep.subr.mxu1 %v805_v56 }
  0x45   : > { %1819 = vmatpush3.msra.mxu1 %v805_v56  ;;  %1814 = vmatpush3.msra.mxu0 %v808_v55 }
  0x46   : > { %1820 = vmatprep.subr.mxu1 %v804_v57  ;;  %1826 = vmatprep.mubr.msk.f32.mxu1 %vm797_vm2, %v800_v58 }
  0x47   : > { %1821 = vmatpush3.msra.mxu1 %v804_v57  ;;  %1816 = vmatmul.mubr.msk.f32.vlgmr.msra.gmra.mxu0 %vm797_vm2, %v807_v59 }
  0x48   : > { %1822 = vmatprep.subr.mxu1 %v803_v60  ;;  %1829 = vmatprep.subr.mxu0 %v977_v61 }
  0x49   : > { %1823 = vmatpush3.msra.mxu1 %v803_v60  ;;  %1830 = vmatpush3.msra.mxu0 %v977_v61 }
  0x4a   : > { %1824 = vmatprep.subr.mxu1 %v802_v62  ;;  %1831 = vmatprep.subr.mxu0 %v976_v63 }
  0x4b   : > { %1825 = vmatpush3.msra.mxu1 %v802_v62  ;;  %1832 = vmatpush3.msra.mxu0 %v976_v63 }
  0x4c   : > { %1827 = vmatmul.mubr.msk.f32.vlgmr.msra.gmra.mxu1 %vm797_vm2, %v801_v0  ;;  %1833 = vmatprep.subr.mxu0 %v975_v1 }
  0x4d   : > { %1834 = vmatpush3.msra.mxu0 %v975_v1 }
  0x4e   : > { %1835 = vmatprep.subr.mxu0 %v974_v2 }
  0x4f   : > { %1836 = vmatpush3.msra.mxu0 %v974_v2 }
 0x100   : > { %v720_v3 = vpop.f32.mrf.mxu1 }
 0x101   : > { %798 = vst.msk [vmem:[#allocation2] sm:$0xff] %vm797_vm2, %v720_v3  ;;  %1837 = vmatprep.mubr.msk.f32.mxu0 %vm797_vm2, %v720_v3 }
 0x102   : > { %v1799_v4 = vpop.f32.mrf.mxu1 }
 0x104   : > { %v793_v5 = vpop.f32.mrf.mxu1 }
 0x105   : > { %799 = vst.msk [vmem:[#allocation2 + $0x8] sm:$0xff] %vm797_vm2, %v793_v5  ;;  %1838 = vmatmul.mubr.msk.f32.vlgmr.msra.gmra.mxu0 %vm797_vm2, %v793_v5 }
 0x106   : > { %v1806_v6 = vpop.f32.mrf.mxu1 }
 0x107   : > { %v1817_v8 = vpop.f32.mrf.mxu0 }
 0x109   : > { %v884_v10 = vpop.f32.mrf.mxu0 }
 0x10c   : > { %v1828_v9 = vpop.f32.mrf.mxu1 }
 0x10d   : > { %v971_v12 = vadd.f32 %v1828_v9, %v1817_v8 }
 0x10e   : > { %v965_v11 = vpop.f32.mrf.mxu1 }
 0x10f   : > { %v966_v15 = vadd.f32 %v965_v11, %v884_v10 }
 0x1c5   : > { %v1839_v13 = vpop.f32.mrf.mxu0 }
 0x1c6   : > { %v1060_v16 = vadd.f32 %v1839_v13, %v971_v12 }
 0x1c7   : > { %v1050_v17 = vpop.f32.mrf.mxu0 }
 0x1c8   : > { %v1064_v18 = vadd.f32 %v1062_v14, %v1060_v16  ;;  %v1059_v19 = vadd.f32 %v1050_v17, %v966_v15 }
 0x1ca   : > { %v1748_v20 = vmul.f32 -1.442695, %v1064_v18  ;;  %v1063_v21 = vadd.f32 %v1062_v14, %v1059_v19 }
 0x1cc   : > { %1895 = vpow2.f32 %v1748_v20  ;;  %v1747_v22 = vmul.f32 -1.442695, %v1063_v21 }
 0x1ce   : > { %1897 = vpow2.f32 %v1747_v22 }
 0x1d9   : > { %v1896_v23 = vpop.eup %1895 }
 0x1da   : > { %v1072_v24 = vadd.f32 1.0, %v1896_v23 }
 0x1db   : > { %v1898_v25 = vpop.eup %1897 }
 0x1dc   : > { %1899 = vrcp.f32 %v1072_v24  ;;  %v1071_v26 = vadd.f32 1.0, %v1898_v25 }
 0x1de   : > { %1901 = vrcp.f32 %v1071_v26 }
 0x1e9   : > { %v1900_v27 = vpop.eup %1899 }
 0x1ea   : > { %1079 = vst.msk [vmem:[%s2375_s10 + $0x8] sm:$0xff] %vm1077_vm3, %v1900_v27 }
 0x1eb   : > { %v1902_v28 = vpop.eup %1901 }
 0x1ec   : > { %1078 = vst.msk [vmem:[%s2375_s10] sm:$0xff] %vm1077_vm3, %v1902_v28 }
 0x1ed PF: > { %v1103_v29 = vld [vmem:[%s2139_s12 + $0x78] sm:$0xff]  ;;  %v1102_v31 = vld [vmem:[%s2139_s12 + $0x70] sm:$0xff]  ;;  %v1101_v33 = vld [vmem:[%s2139_s12 + $0x68] sm:$0xff]  ;;  %vm1104_vm4 = vcmask 261120   ;;  %v1964_v47 = vmov 0.0   ;;  %v1370_v60 = vlaneseq  ;;  %vm1438_vm5 = vcmask 7168  }
 0x1ee   : > { %v1093_v30 = vld [vmem:[%s2139_s12 + $0x38] sm:$0xff]  ;;  %1135 = vmatprep.subr.mxu0 %v1103_v29  ;;  %v1092_v32 = vld [vmem:[%s2139_s12 + $0x30] sm:$0xff]  ;;  %v1091_v34 = vld [vmem:[%s2139_s12 + $0x28] sm:$0xff]  ;;  %1175 = vmatprep.mubr.f32.mxu0 %v1964_v47  ;;  %v1965_v29 = vmov 0   ;;  %p1755_p13 = scmp.ne.s32.totalorder %s1951_s21, 1 }
 0x1ef   : > { %1218 = vmatprep.subr.mxu1 %v1093_v30  ;;  %1136 = vmatpush1.msra.mxu0 %v1102_v31  ;;  %v1100_v35 = vld [vmem:[%s2139_s12 + $0x60] sm:$0xff]  ;;  %v1099_v37 = vld [vmem:[%s2139_s12 + $0x58] sm:$0xff]  ;;  %v1098_v39 = vld [vmem:[%s2139_s12 + $0x50] sm:$0xff]  ;;  %v1371_v1 = vshrl.u32 %v1370_v60, 7 }
 0x1f0   : > { %1219 = vmatpush1.msra.mxu1 %v1092_v32  ;;  %v1090_v36 = vld [vmem:[%s2139_s12 + $0x20] sm:$0xff]  ;;  %1137 = vmatprep.subr.mxu0 %v1101_v33  ;;  %v1089_v38 = vld [vmem:[%s2139_s12 + $0x18] sm:$0xff]  ;;  %v1088_v40 = vld [vmem:[%s2139_s12 + $0x10] sm:$0xff] }
 0x1f1   : > { %1220 = vmatprep.subr.mxu1 %v1091_v34  ;;  %1138 = vmatpush1.msra.mxu0 %v1100_v35  ;;  %v1097_v41 = vld [vmem:[%s2139_s12 + $0x48] sm:$0xff]  ;;  %v1096_v43 = vld [vmem:[%s2139_s12 + $0x40] sm:$0xff]  ;;  %v1094_v45 = vld [vmem:[%s2366_s1] sm:$0xff]  ;;  %v1372_v4 = vsub.s32 0, %v1371_v1  ;;  %v1376_v8 = vsub.s32 1, %v1371_v1 }
 0x1f2   : > { %1221 = vmatpush1.msra.mxu1 %v1090_v36  ;;  %v1087_v42 = vld [vmem:[%s2139_s12 + $0x8] sm:$0xff]  ;;  %1139 = vmatprep.subr.mxu0 %v1099_v37  ;;  %v1086_v44 = vld [vmem:[%s2139_s12] sm:$0xff]  ;;  %v1084_v46 = vld [vmem:[%s2365_s0] sm:$0xff] }
 0x1f3   : > { %1222 = vmatprep.subr.mxu1 %v1089_v38  ;;  %1140 = vmatpush1.msra.mxu0 %v1098_v39  ;;  %v1280_v48 = vld [vmem:[%s2139_s12 + $0xb8] sm:$0xff]  ;;  %v1279_v49 = vld [vmem:[%s2139_s12 + $0xb0] sm:$0xff]  ;;  %v1278_v50 = vld [vmem:[%s2139_s12 + $0xa8] sm:$0xff] }
 0x1f4   : > { %1223 = vmatpush1.msra.mxu1 %v1088_v40  ;;  %1141 = vmatprep.subr.mxu0 %v1097_v41  ;;  %v1277_v51 = vld [vmem:[%s2139_s12 + $0xa0] sm:$0xff]  ;;  %v1095_v52 = vld [vmem:[%s2366_s1 + $0x8] sm:$0xff]  ;;  %v1275_v55 = vld [vmem:[%s2139_s12 + $0x90] sm:$0xff] }
 0x1f5   : > { %1224 = vmatprep.subr.mxu1 %v1087_v42  ;;  %1142 = vmatpush1.msra.mxu0 %v1096_v43  ;;  %v1085_v53 = vld [vmem:[%s2365_s0 + $0x8] sm:$0xff]  ;;  %v1274_v56 = vld [vmem:[%s2139_s12 + $0x88] sm:$0xff]  ;;  %v1273_v57 = vld [vmem:[%s2139_s12 + $0x80] sm:$0xff] }
 0x1f6   : > { %1225 = vmatpush1.msra.mxu1 %v1086_v44  ;;  %1258 = vmatprep.mubr.f32.mxu1 %v1964_v47  ;;  %v1276_v54 = vld [vmem:[%s2139_s12 + $0x98] sm:$0xff]  ;;  %v1271_v58 = vld [vmem:[#allocation2] sm:$0xff]  ;;  %v1394_v30 = vld [vmem:[#allocation3] sm:$0xff] }
 0x1f7   : > { %1749 = vmatmul.mubr.msk.f32.vlgmr.msra.gmra.mxu0 %vm1104_vm4, %v1094_v45  ;;  %1751 = vmatmul.mubr.msk.f32.vlgmr.msra.gmra.mxu1 %vm1104_vm4, %v1084_v46  ;;  %v1272_v59 = vld [vmem:[#allocation2 + $0x8] sm:$0xff]  ;;  %v1368_v7 = vld [vmem:[%s596_s30] sm:$0x3]  ;;  %v1395_v33 = vld [vmem:[#allocation3 + $0x8] sm:$0xff] }
 0x1f8   : > { %1311 = vmatprep.subr.mxu0 %v1280_v48  ;;  %1840 = vmatprep.subr.mxu1 %v1280_v48  ;;  %v1373_v11 = vrot.slane %v1368_v7, %v1372_v4  ;;  %v1377_v14 = vrot.slane %v1368_v7, %v1376_v8 }
 0x1f9   : > { %1312 = vmatpush1.msra.mxu0 %v1279_v49  ;;  %1844 = vmatpush1.msra.mxu1 %v1279_v49 }
 0x1fa   : > { %1313 = vmatprep.subr.mxu0 %v1278_v50  ;;  %1841 = vmatprep.subr.mxu1 %v1278_v50 }
 0x1fb   : > { %1181 = vmatprep.mubr.f32.mxu0 %v1964_v47  ;;  %1264 = vmatprep.mubr.f32.mxu1 %v1964_v47 }
 0x1fc   : > { %1314 = vmatpush1.msra.mxu0 %v1277_v51  ;;  %1845 = vmatpush1.msra.mxu1 %v1277_v51 }
 0x1fd   : > { %1750 = vmatmul.mubr.msk.f32.gmra.mxu0 %vm1104_vm4, %v1095_v52  ;;  %1752 = vmatmul.mubr.msk.f32.gmra.mxu1 %vm1104_vm4, %v1085_v53 }
 0x1fe   : > { %1315 = vmatprep.subr.mxu0 %v1276_v54  ;;  %1842 = vmatprep.subr.mxu1 %v1276_v54 }
 0x1ff   : > { %1316 = vmatpush1.msra.mxu0 %v1275_v55  ;;  %1846 = vmatpush1.msra.mxu1 %v1275_v55 }
 0x200   : > { %1317 = vmatprep.subr.mxu0 %v1274_v56  ;;  %1843 = vmatprep.subr.mxu1 %v1274_v56 }
 0x201   : > { %1318 = vmatpush1.msra.mxu0 %v1273_v57  ;;  %1847 = vmatpush1.msra.mxu1 %v1273_v57  ;;  %v1398_v57 = vld [vmem:[#allocation4] sm:$0xff] }
 0x202   : > { %1351 = vmatprep.mubr.f32.mxu0 %v1964_v47  ;;  %1357 = vmatprep.mubr.f32.mxu1 %v1964_v47 }
 0x203   : > { %1753 = vmatmul.mubr.msk.f32.vlgmr.msra.gmra.mxu0 %vm1104_vm4, %v1271_v58  ;;  %1754 = vmatmul.mubr.msk.f32.vlgmr.msra.gmra.mxu1 %vm1104_vm4, %v1272_v59 }
 0x204   : > { %1903 = vset.pattern.permute.xlu1 %v1965_v29  ;;  %1904 = vset.pattern.permute.xlu0 %v1965_v29 }
 0x2b7   : > { %v1177_v61 = vpop.f32.mrf.mxu0  ;;  %v1260_v62 = vpop.f32.mrf.mxu1 }
 0x2b8   : > { %v1261_v9 = vadd.f32 %v1260_v62, %v1177_v61  ;;  %v1399_v61 = vld [vmem:[#allocation4 + $0x8] sm:$0xff] }
 0x2b9   : > { %v1179_v63 = vpop.f32.mrf.mxu0  ;;  %v1262_v0 = vpop.f32.mrf.mxu1 }
 0x2ba   : > { %v1263_v15 = vadd.f32 %v1262_v0, %v1179_v63 }
 0x2bd   : > { %v1183_v2 = vpop.f32.mrf.mxu0  ;;  %v1266_v3 = vpop.f32.mrf.mxu1 }
 0x2be   : > { %v1267_v10 = vadd.f32 %v1266_v3, %v1183_v2 }
 0x2bf   : > { %v1185_v5 = vpop.f32.mrf.mxu0  ;;  %v1268_v6 = vpop.f32.mrf.mxu1 }
 0x2c0   : > { %v1269_v16 = vadd.f32 %v1268_v6, %v1185_v5 }
 0x2c3   : > { %v1353_v12 = vpop.f32.mrf.mxu0  ;;  %v1359_v13 = vpop.f32.mrf.mxu1 }
 0x2c4   : > { %v1364_v17 = vadd.f32 %v1353_v12, %v1261_v9  ;;  %v1366_v18 = vadd.f32 %v1359_v13, %v1267_v10 }
 0x2c5   : > { %v1355_v19 = vpop.f32.mrf.mxu0  ;;  %v1361_v20 = vpop.f32.mrf.mxu1 }
 0x2c6   : > { %v1380_v21 = vadd.f32 %v1373_v11, %v1364_v17  ;;  %v1382_v22 = vadd.f32 %v1373_v11, %v1366_v18  ;;  %v1365_v23 = vadd.f32 %v1355_v19, %v1263_v15  ;;  %v1367_v24 = vadd.f32 %v1361_v20, %v1269_v16 }
 0x2c8   : > { %1384 = vst [vmem:[%s2141_s13] sm:$0xff] %v1380_v21  ;;  %1386 = vst [vmem:[%s2141_s13 + $0x10] sm:$0xff] %v1382_v22  ;;  %v1381_v25 = vadd.f32 %v1377_v14, %v1365_v23  ;;  %v1383_v26 = vadd.f32 %v1377_v14, %v1367_v24 }
 0x2ca   : > { %1385 = vst [vmem:[%s2141_s13 + $0x8] sm:$0xff] %v1381_v25  ;;  %1387 = vst [vmem:[%s2141_s13 + $0x18] sm:$0xff] %v1383_v26  ;;  %v1388_v27 = vmax.f32 %v1380_v21, %v1381_v25  ;;  %v1391_v28 = vmax.f32 %v1382_v22, %v1383_v26 }
 0x2cc   : > { %1389 = vmax.xlane.f32.xlu0 %v1388_v27 }
 0x2d0   : > { %1392 = vmax.xlane.f32.xlu0 %v1391_v28 }
 0x355   : > { %v1390_v31 = vpop.xlane.xlu0 %1389 }
 0x356   : > { %v1396_v32 = vmax.f32 %v1394_v30, %v1390_v31 }
 0x358   : > { %v1400_v34 = vsub.f32 %v1394_v30, %v1396_v32  ;;  %1441 = vst.msk [vmem:[#allocation3] sm:$0xff] %vm1438_vm5, %v1396_v32  ;;  %1410 = vperm.xlu1 %1903, %v1396_v32  }
 0x359   : > { %v1393_v35 = vpop.xlane.xlu0 %1392 }
 0x35a   : > { %v1397_v36 = vmax.f32 %v1395_v33, %v1393_v35  ;;  %v1402_v54 = vmul.f32 1.442695, %v1400_v34 }
 0x35c   : > { %v1401_v37 = vsub.f32 %v1395_v33, %v1397_v36  ;;  %1442 = vst.msk [vmem:[#allocation3 + $0x8] sm:$0xff] %vm1438_vm5, %v1397_v36  ;;  %1415 = vperm.xlu1 %1903, %v1397_v36  }
 0x35e   : > { %v1404_v55 = vmul.f32 1.442695, %v1401_v37 }
 0x3d3   : > { %v1411_v38 = vpop.permute.xlu1 %1410 }
 0x3d4   : > { %v1418_v39 = vsub.f32 %v1380_v21, %v1411_v38  ;;  %v1419_v40 = vsub.f32 %v1381_v25, %v1411_v38 }
 0x3d6   : > { %v1422_v41 = vmul.f32 1.442695, %v1418_v39  ;;  %v1424_v42 = vmul.f32 1.442695, %v1419_v40 }
 0x3d7   : > { %v1416_v43 = vpop.permute.xlu1 %1415 }
 0x3d8   : > { %1905 = vpow2.f32 %v1422_v41  ;;  %v1420_v44 = vsub.f32 %v1382_v22, %v1416_v43  ;;  %v1421_v45 = vsub.f32 %v1383_v26, %v1416_v43 }
 0x3d9   : > { %1907 = vpow2.f32 %v1424_v42 }
 0x3da   : > { %v1426_v46 = vmul.f32 1.442695, %v1420_v44  ;;  %v1428_v47 = vmul.f32 1.442695, %v1421_v45 }
 0x3dc   : > { %1909 = vpow2.f32 %v1426_v46 }
 0x3dd   : > { %1911 = vpow2.f32 %v1428_v47 }
 0x3de   : > { %1913 = vpow2.f32 %v1402_v54 }
 0x3df   : > { %1915 = vpow2.f32 %v1404_v55 }
 0x3e5   : > { %v1906_v48 = vpop.eup %1905 }
 0x3e6   : > { %v1908_v49 = vpop.eup %1907 }
 0x3e7   : > { %v1430_v50 = vadd.f32 %v1908_v49, %v1906_v48 }
 0x3e9   : > { %v1910_v51 = vpop.eup %1909  ;;  %1431 = vadd.xlane.f32.xlu0 %v1430_v50 }
 0x3ea   : > { %v1912_v52 = vpop.eup %1911 }
 0x3eb   : > { %v1433_v53 = vadd.f32 %v1912_v52, %v1910_v51  ;;  %v1914_v56 = vpop.eup %1913 }
 0x3ec   : > { %v1406_v58 = vmul.f32 %v1914_v56, %v1398_v57  ;;  %v1916_v59 = vpop.eup %1915 }
 0x3ed   : > { %1434 = vadd.xlane.f32.xlu1 %v1433_v53  ;;  %v1407_v63 = vmul.f32 %v1916_v59, %v1399_v61 }
 0x472   : > { %v1432_v60 = vpop.xlane.xlu0 %1431 }
 0x473   : > { %v1436_v62 = vadd.f32 %v1432_v60, %v1406_v58 }
 0x475   : > { %1439 = vst.msk [vmem:[#allocation4] sm:$0xff] %vm1438_vm5, %v1436_v62  ;;  %1446 = sbr.rel (%p1755_p13) target bundleno = 1172 (0x494), region = 83 }
 0x476   : > { %v1435_v0 = vpop.xlane.xlu1 %1434 }
 0x477   : > { %v1437_v1 = vadd.f32 %v1435_v0, %v1407_v63 }
 0x479   : > { %1440 = vst.msk [vmem:[#allocation4 + $0x8] sm:$0xff] %vm1438_vm5, %v1437_v1 }
 0x47a   : > { %v1447_v5 = vld [vmem:[#allocation3] sm:$0xff]  ;;  %v1448_v8 = vld [vmem:[#allocation3 + $0x8] sm:$0xff] }
 0x47c   : > { %v1449_v2 = vld [vmem:[#allocation4] sm:$0xff] }
 0x47d   : > { %1917 = vlog2.f32 %v1449_v2 }
 0x480   : > { %v1450_v3 = vld [vmem:[#allocation4 + $0x8] sm:$0xff] }
 0x481   : > { %1919 = vlog2.f32 %v1450_v3 }
 0x48a   : > { %v1918_v4 = vpop.eup %1917 }
 0x48b   : > { %v1452_v7 = vmul.f32 0.6931472, %v1918_v4 }
 0x48d   : > { %v1455_v10 = vadd.f32 %v1452_v7, %v1447_v5 }
 0x48e   : > { %v1920_v6 = vpop.eup %1919 }
 0x48f   : > { %v1454_v9 = vmul.f32 0.6931472, %v1920_v6  ;;  %1457 = vst.msk [vmem:[%s2376_s11] sm:$0xff] %vm1438_vm5, %v1455_v10 }
 0x491   : > { %v1456_v11 = vadd.f32 %v1454_v9, %v1448_v8 }
 0x493   : > { %1458 = vst.msk [vmem:[%s2376_s11 + $0x8] sm:$0xff] %vm1438_vm5, %v1456_v11 }
 0x494 PF: > { %1480 = sbr.rel (!%p2064_p6) target bundleno = 1177 (0x499), region = 87  ;;  %s1768_s24 = sshll.u32 (%p2064_p6), %s1951_s21, 4  ;;  %v1499_v12 = vld [vmem:[%s2141_s13] sm:$0xff] (%p2064_p6)  ;;  %v1501_v13 = vld [vmem:[%s2141_s13 + $0x8] sm:$0xff] (%p2064_p6)  ;;  %v1503_v14 = vld [vmem:[%s2141_s13 + $0x10] sm:$0xff] (%p2064_p6) }
 0x495   : > { %s1486_s29 = scalar_lea.vmem (%p2064_p6), %s2373_s8, %s1768_s24  ;;  %v1505_v15 = vld [vmem:[%s2141_s13 + $0x18] sm:$0xff] (%p2064_p6) }
 0x496   : > { %1500 = vst [vmem:[%s1486_s29] sm:$0xff] (%p2064_p6), %v1499_v12  ;;  %1502 = vst [vmem:[%s1486_s29 + $0x8] sm:$0xff] (%p2064_p6), %v1501_v13 }
 0x497   : > { %1504 = vst [vmem:[%s1486_s29 + $0x20] sm:$0xff] (%p2064_p6), %v1503_v14  ;;  %1506 = vst [vmem:[%s1486_s29 + $0x28] sm:$0xff] (%p2064_p6), %v1505_v15 }
 0x499 PF: > { %s23_s23 = sadd.s32 1, %s1959_s23   ;;  %s2380_s19 = smov %s1947_s20 }
 0x49a   : > { %p20_p0 = scmp.ge.s32.totalorder %s23_s23, 4   ;;  %s2381_s20 = smov %s2069_s28 }
 0x49b   : > { %s2382_s21 = smov %s1955_s22  ;;  %s2383_s22 = smov %s2385_s7 }
 0x49c   :  { %22 = sbr.rel (!%p20_p0) target bundleno = 6 (0x6), region = 192 }

</bundles_post_ra>
